<compile_context>
chip_gen: v6e
topology: v6e:2x2x1
jax: 0.10.0
libtpu: 0.0.40
codegen_flags: <defaults>
</compile_context>

<pallas_src>
import jax
import jax.numpy as jnp
from jax import lax
from jax.experimental import pallas as pl
from jax.experimental.pallas import tpu as pltpu

N_IN = 784
N_HID = 128
N_OUT = 27
N_OUT_PAD = 128  # lane-dense class dimension


def bobnet_kernel(x_ref, w1_ref, w2_ref, o_ref):
    # Hidden layer: relu(x @ W1^T). w1_ref holds W1 in (128, 784) layout, so
    # contract dim 1 of x with dim 1 of W1 (no transpose materialized).
    h = lax.dot_general(
        x_ref[...], w1_ref[...],
        dimension_numbers=(((1,), (1,)), ((), ())),
        preferred_element_type=jnp.float32)
    h = jnp.maximum(h, 0.0)

    # Output layer: h @ W2^T with W2 zero-padded to (128, 128) classes.
    logits = lax.dot_general(
        h, w2_ref[...],
        dimension_numbers=(((1,), (1,)), ((), ())),
        preferred_element_type=jnp.float32)

    # Mask the padded classes to a huge negative value so log-softmax over the
    # real 27 classes is exact.
    col = lax.broadcasted_iota(jnp.int32, logits.shape, 1)
    logits = jnp.where(col < N_OUT, logits, jnp.float32(-1e30))

    # Numerically-stable LogSoftmax over the class axis.
    m = jnp.max(logits, axis=1, keepdims=True)
    shifted = logits - m
    lse = jnp.log(jnp.sum(jnp.exp(shifted), axis=1, keepdims=True))
    o_ref[...] = shifted - lse


def bobnet_forward(x, w1, w2, *, max_tile_b=512):
    """x: (B, 784) f32; w1: (128, 784) f32; w2: (27, 128) f32 -> (B, 27) f32."""
    B = x.shape[0]

    # Batch tile: multiple of 128 (MXU height), capped at max_tile_b.
    tile_b = min(max_tile_b, max(128, ((B + 127) // 128) * 128))
    b_pad = pl.cdiv(B, tile_b) * tile_b
    if b_pad != B:
        x = jnp.pad(x, ((0, b_pad - B), (0, 0)))

    # Zero-pad class dim of W2 once per call (64 KB, negligible).
    w2p = jnp.zeros((N_OUT_PAD, N_HID), w2.dtype).at[:N_OUT].set(w2)

    grid = (b_pad // tile_b,)
    out = pl.pallas_call(
        bobnet_kernel,
        out_shape=jax.ShapeDtypeStruct((b_pad, N_OUT_PAD), jnp.float32),
        grid=grid,
        in_specs=[
            pl.BlockSpec((tile_b, N_IN), lambda i: (i, 0)),      # streamed x tile
            pl.BlockSpec((N_HID, N_IN), lambda i: (0, 0)),       # W1 (resident)
            pl.BlockSpec((N_OUT_PAD, N_HID), lambda i: (0, 0)),  # W2 padded (resident)
        ],
        out_specs=pl.BlockSpec((tile_b, N_OUT_PAD), lambda i: (i, 0)),
        compiler_params=pltpu.CompilerParams(
            dimension_semantics=("parallel",)),
    )(x, w1, w2p)

    return out[:B, :N_OUT]


def _reference(x, w1, w2):
    h = jnp.maximum(x @ w1.T, 0.0)
    logits = h @ w2.T
    return jax.nn.log_softmax(logits, axis=1)


if __name__ == "__main__":
    key = jax.random.PRNGKey(0)
    kx, k1, k2 = jax.random.split(key, 3)

    B = 8  # small batch (padded internally to one 128-row MXU tile)
    # Deterministic init mimicking nn.Linear's uniform(-1/sqrt(fan_in), 1/sqrt(fan_in))
    w1 = jax.random.uniform(k1, (N_HID, N_IN), jnp.float32,
                            minval=-1.0 / jnp.sqrt(784.0), maxval=1.0 / jnp.sqrt(784.0))
    w2 = jax.random.uniform(k2, (N_OUT, N_HID), jnp.float32,
                            minval=-1.0 / jnp.sqrt(128.0), maxval=1.0 / jnp.sqrt(128.0))
    x = jax.random.normal(kx, (B, N_IN), jnp.float32)

    out = bobnet_forward(x, w1, w2)
    jax.block_until_ready(out)

    ref = _reference(x, w1, w2)
    assert out.shape == (B, N_OUT)
    assert jnp.allclose(out, ref, atol=1e-5, rtol=1e-5)

    print("KERNEL_OK")
</pallas_src>

<mosaic_0001>
module attributes {stable_mosaic.version = 11 : i64} {
  func.func @bobnet_kernel(%arg0: i32, %arg1: memref<128x784xf32, #tpu.memory_space<vmem>>, %arg2: memref<128x784xf32, #tpu.memory_space<vmem>>, %arg3: memref<128x128xf32, #tpu.memory_space<vmem>>, %arg4: memref<128x128xf32, #tpu.memory_space<vmem>>) attributes {dimension_semantics = [#tpu.dimension_semantics<parallel>], iteration_bounds = array<i64: 1>, scalar_prefetch = 0 : i64, scratch_operands = 0 : i64, tpu.core_type = #tpu.core_type<tc>, window_params = [{transform_indices = @transform_0, window_bounds = array<i64: 128, 784>}, {pipeline_mode = #tpu.pipeline_mode<synchronous>, transform_indices = @transform_1, window_bounds = array<i64: 128, 784>}, {pipeline_mode = #tpu.pipeline_mode<synchronous>, transform_indices = @transform_2, window_bounds = array<i64: 128, 128>}, {transform_indices = @transform_3, window_bounds = array<i64: 128, 128>}]} {
    %c0 = arith.constant 0 : index
    %c0_0 = arith.constant 0 : index
    %0 = vector.load %arg1[%c0, %c0_0] : memref<128x784xf32, #tpu.memory_space<vmem>>, vector<128x784xf32>
    %c0_1 = arith.constant 0 : index
    %c0_2 = arith.constant 0 : index
    %1 = vector.load %arg2[%c0_1, %c0_2] : memref<128x784xf32, #tpu.memory_space<vmem>>, vector<128x784xf32>
    %cst = arith.constant dense<0.000000e+00> : vector<128x128xf32>
    %2 = tpu.matmul %0, %1, %cst {dimension_numbers = #tpu.dot_dimension_numbers<[1], [1], [0], [0], [0, 0, 1, 0], [], []>} : vector<128x784xf32>, vector<128x784xf32>, vector<128x128xf32> -> vector<128x128xf32>
    %cst_3 = arith.constant 0.000000e+00 : f32
    %3 = vector.broadcast %cst_3 : f32 to vector<128x128xf32>
    %4 = arith.maximumf %2, %3 : vector<128x128xf32>
    %c0_4 = arith.constant 0 : index
    %c0_5 = arith.constant 0 : index
    %5 = vector.load %arg3[%c0_4, %c0_5] : memref<128x128xf32, #tpu.memory_space<vmem>>, vector<128x128xf32>
    %cst_6 = arith.constant dense<0.000000e+00> : vector<128x128xf32>
    %6 = tpu.matmul %4, %5, %cst_6 {dimension_numbers = #tpu.dot_dimension_numbers<[1], [1], [0], [0], [0, 0, 1, 0], [], []>} : vector<128x128xf32>, vector<128x128xf32>, vector<128x128xf32> -> vector<128x128xf32>
    %7 = tpu.iota {dimensions = array<i32: 1>} : vector<128x128xi32>
    %c27_i32 = arith.constant 27 : i32
    %8 = vector.broadcast %c27_i32 : i32 to vector<128x128xi32>
    %9 = arith.cmpi slt, %7, %8 : vector<128x128xi32>
    %cst_7 = arith.constant -1.000000e+30 : f32
    %10 = vector.broadcast %cst_7 : f32 to vector<128x128xf32>
    %11 = arith.select %9, %6, %10 : vector<128x128xi1>, vector<128x128xf32>
    %cst_8 = arith.constant dense<0xFF800000> : vector<128xf32>
    %12 = vector.multi_reduction <maximumf>, %11, %cst_8 [1] : vector<128x128xf32> to vector<128xf32>
    %13 = vector.shape_cast %12 : vector<128xf32> to vector<128x1xf32>
    %14 = vector.broadcast %13 : vector<128x1xf32> to vector<128x128xf32>
    %15 = arith.subf %11, %14 : vector<128x128xf32>
    %16 = math.exp %15 : vector<128x128xf32>
    %cst_9 = arith.constant dense<0.000000e+00> : vector<128xf32>
    %17 = vector.multi_reduction <add>, %16, %cst_9 [1] : vector<128x128xf32> to vector<128xf32>
    %18 = vector.shape_cast %17 : vector<128xf32> to vector<128x1xf32>
    %19 = math.log %18 : vector<128x1xf32>
    %20 = vector.broadcast %19 : vector<128x1xf32> to vector<128x128xf32>
    %21 = arith.subf %15, %20 : vector<128x128xf32>
    %c0_10 = arith.constant 0 : index
    %c0_11 = arith.constant 0 : index
    %22 = vector.load %arg4[%c0_10, %c0_11] : memref<128x128xf32, #tpu.memory_space<vmem>>, vector<128x128xf32>
    tpu.vector_store %arg4[%c0_10, %c0_11], %21 {strides = array<i32>} : memref<128x128xf32, #tpu.memory_space<vmem>>, vector<128x128xf32>,
    return
  }
  func.func @transform_0(%arg0: i32) -> (i32, i32) {
    %c0_i32 = arith.constant 0 : i32
    %c0_i32_0 = arith.constant 0 : i32
    return %arg0, %c0_i32 : i32, i32
  }
  func.func @transform_1(%arg0: i32) -> (i32, i32) {
    %c0_i32 = arith.constant 0 : i32
    %c0_i32_0 = arith.constant 0 : i32
    %c0_i32_1 = arith.constant 0 : i32
    return %c0_i32, %c0_i32_0 : i32, i32
  }
  func.func @transform_2(%arg0: i32) -> (i32, i32) {
    %c0_i32 = arith.constant 0 : i32
    %c0_i32_0 = arith.constant 0 : i32
    %c0_i32_1 = arith.constant 0 : i32
    return %c0_i32, %c0_i32_0 : i32, i32
  }
  func.func @transform_3(%arg0: i32) -> (i32, i32) {
    %c0_i32 = arith.constant 0 : i32
    %c0_i32_0 = arith.constant 0 : i32
    return %arg0, %c0_i32 : i32, i32
  }
}

</mosaic_0001>

<bundles_post_ra>
// kernel: tpu_custom_call.1
= control target key start
LH: loop header
LB: loop body
LE: loop exit
PB: predicated region body
PF: predicated region fallthrough
CT: control target
= control target key end

     0   :  { %vm239_vm0 = vcmask 130048   ;;  %s2635_s0 = inlined_call_operand.vmem [shape: f32[128,784], index: 0, kind: input, shape index: {}]   ;;  %s2636_s1 = inlined_call_operand.vmem [shape: f32[128,784], index: 1, kind: input, shape index: {}]   ;;  %s2637_s2 = inlined_call_operand.vmem [shape: f32[128,128], index: 2, kind: input, shape index: {}]   ;;  %s2638_s3 = inlined_call_operand.hbm [shape: f32[128,128], index: 3, kind: output, shape index: {}]  }
   0x1   :  { %v233_v0 = vld [vmem:[%s2636_s1 + $0x350] sm:$0xff]  ;;  %v235_v1 = vld [vmem:[%s2636_s1 + $0x360] sm:$0xff]  ;;  %v232_v2 = vld [vmem:[%s2636_s1 + $0x348] sm:$0xff] }
   0x2   :  { %336 = vmatprep.subr.mxu0 %v233_v0  ;;  %481 = vmatprep.subr.mxu1 %v235_v1  ;;  %v234_v3 = vld [vmem:[%s2636_s1 + $0x358] sm:$0xff]  ;;  %v228_v5 = vld [vmem:[%s2636_s1 + $0x328] sm:$0xff]  ;;  %v225_v6 = vld [vmem:[%s2636_s1 + $0x310] sm:$0xff] }
   0x3   :  { %v226_v4 = vld [vmem:[%s2636_s1 + $0x318] sm:$0xff]  ;;  %337 = vmatpush1.xpose.msra.mxu0 %v232_v2  ;;  %482 = vmatpush1.xpose.msra.mxu1 %v234_v3  ;;  %v227_v7 = vld [vmem:[%s2636_s1 + $0x320] sm:$0xff]  ;;  %v221_v9 = vld [vmem:[%s2636_s1 + $0x2f0] sm:$0xff] }
   0x4   :  { %338 = vmatprep.subr.mxu0 %v226_v4  ;;  %483 = vmatprep.subr.mxu1 %v228_v5  ;;  %v219_v8 = vld [vmem:[%s2636_s1 + $0x2e0] sm:$0xff]  ;;  %v218_v10 = vld [vmem:[%s2636_s1 + $0x2d8] sm:$0xff]  ;;  %v220_v11 = vld [vmem:[%s2636_s1 + $0x2e8] sm:$0xff] }
   0x5   :  { %v212_v12 = vld [vmem:[%s2636_s1 + $0x2a8] sm:$0xff]  ;;  %v214_v13 = vld [vmem:[%s2636_s1 + $0x2b8] sm:$0xff]  ;;  %v211_v14 = vld [vmem:[%s2636_s1 + $0x2a0] sm:$0xff] }
   0x6   :  { %v213_v15 = vld [vmem:[%s2636_s1 + $0x2b0] sm:$0xff]  ;;  %v207_v17 = vld [vmem:[%s2636_s1 + $0x280] sm:$0xff]  ;;  %v204_v18 = vld [vmem:[%s2636_s1 + $0x268] sm:$0xff] }
   0x7   :  { %339 = vmatpush1.xpose.msra.mxu0 %v225_v6  ;;  %484 = vmatpush1.xpose.msra.mxu1 %v227_v7  ;;  %v205_v16 = vld [vmem:[%s2636_s1 + $0x270] sm:$0xff]  ;;  %v206_v19 = vld [vmem:[%s2636_s1 + $0x278] sm:$0xff]  ;;  %v200_v21 = vld [vmem:[%s2636_s1 + $0x248] sm:$0xff] }
   0x8   :  { %340 = vmatprep.subr.mxu0 %v219_v8  ;;  %485 = vmatprep.subr.mxu1 %v221_v9  ;;  %v198_v20 = vld [vmem:[%s2636_s1 + $0x238] sm:$0xff]  ;;  %v197_v22 = vld [vmem:[%s2636_s1 + $0x230] sm:$0xff]  ;;  %v199_v23 = vld [vmem:[%s2636_s1 + $0x240] sm:$0xff] }
   0x9   :  { %v191_v24 = vld [vmem:[%s2636_s1 + $0x200] sm:$0xff]  ;;  %v193_v25 = vld [vmem:[%s2636_s1 + $0x210] sm:$0xff]  ;;  %v16_v26 = vld [vmem:[%s2635_s0 + $0x8] sm:$0xff] }
   0xa   :  { %v18_v27 = vld [vmem:[%s2635_s0 + $0x18] sm:$0xff]  ;;  %v192_v29 = vld [vmem:[%s2636_s1 + $0x208] sm:$0xff]  ;;  %400 = vmatprep.mubr.f32.mxu0 %v16_v26  ;;  %v183_v32 = vld [vmem:[%s2636_s1 + $0x1c0] sm:$0xff] }
   0xb   :  { %341 = vmatpush1.xpose.msra.mxu0 %v218_v10  ;;  %486 = vmatpush1.xpose.msra.mxu1 %v220_v11  ;;  %v190_v28 = vld [vmem:[%s2636_s1 + $0x1f8] sm:$0xff]  ;;  %v184_v30 = vld [vmem:[%s2636_s1 + $0x1c8] sm:$0xff]  ;;  %v185_v33 = vld [vmem:[%s2636_s1 + $0x1d0] sm:$0xff] }
   0xc   :  { %342 = vmatprep.subr.mxu0 %v212_v12  ;;  %487 = vmatprep.subr.mxu1 %v214_v13  ;;  %v186_v31 = vld [vmem:[%s2636_s1 + $0x1d8] sm:$0xff]  ;;  %v177_v34 = vld [vmem:[%s2636_s1 + $0x190] sm:$0xff]  ;;  %v179_v35 = vld [vmem:[%s2636_s1 + $0x1a0] sm:$0xff] }
   0xd   :  { %545 = vmatprep.mubr.f32.mxu1 %v18_v27  ;;  %v176_v36 = vld [vmem:[%s2636_s1 + $0x188] sm:$0xff]  ;;  %v178_v37 = vld [vmem:[%s2636_s1 + $0x198] sm:$0xff]  ;;  %v169_v40 = vld [vmem:[%s2636_s1 + $0x150] sm:$0xff] }
   0xe   :  { %v170_v38 = vld [vmem:[%s2636_s1 + $0x158] sm:$0xff]  ;;  %v172_v39 = vld [vmem:[%s2636_s1 + $0x168] sm:$0xff]  ;;  %v171_v41 = vld [vmem:[%s2636_s1 + $0x160] sm:$0xff] }
   0xf   :  { %343 = vmatpush1.xpose.msra.mxu0 %v211_v14  ;;  %488 = vmatpush1.xpose.msra.mxu1 %v213_v15  ;;  %v163_v42 = vld [vmem:[%s2636_s1 + $0x120] sm:$0xff]  ;;  %v165_v43 = vld [vmem:[%s2636_s1 + $0x130] sm:$0xff]  ;;  %v162_v44 = vld [vmem:[%s2636_s1 + $0x118] sm:$0xff] }
  0x10   :  { %344 = vmatprep.subr.mxu0 %v205_v16  ;;  %489 = vmatprep.subr.mxu1 %v207_v17  ;;  %v164_v45 = vld [vmem:[%s2636_s1 + $0x128] sm:$0xff]  ;;  %v158_v47 = vld [vmem:[%s2636_s1 + $0xf8] sm:$0xff]  ;;  %v155_v48 = vld [vmem:[%s2636_s1 + $0xe0] sm:$0xff] }
  0x11   :  { %v156_v46 = vld [vmem:[%s2636_s1 + $0xe8] sm:$0xff]  ;;  %v157_v49 = vld [vmem:[%s2636_s1 + $0xf0] sm:$0xff]  ;;  %v151_v51 = vld [vmem:[%s2636_s1 + $0xc0] sm:$0xff] }
  0x12   :  { %v149_v50 = vld [vmem:[%s2636_s1 + $0xb0] sm:$0xff]  ;;  %v148_v52 = vld [vmem:[%s2636_s1 + $0xa8] sm:$0xff]  ;;  %v150_v53 = vld [vmem:[%s2636_s1 + $0xb8] sm:$0xff] }
  0x13   :  { %345 = vmatpush1.xpose.msra.mxu0 %v204_v18  ;;  %490 = vmatpush1.xpose.msra.mxu1 %v206_v19  ;;  %v142_v54 = vld [vmem:[%s2636_s1 + $0x78] sm:$0xff]  ;;  %v144_v55 = vld [vmem:[%s2636_s1 + $0x88] sm:$0xff]  ;;  %v141_v56 = vld [vmem:[%s2636_s1 + $0x70] sm:$0xff] }
  0x14   :  { %346 = vmatprep.subr.mxu0 %v198_v20  ;;  %491 = vmatprep.subr.mxu1 %v200_v21  ;;  %v143_v57 = vld [vmem:[%s2636_s1 + $0x80] sm:$0xff]  ;;  %v137_v59 = vld [vmem:[%s2636_s1 + $0x50] sm:$0xff]  ;;  %v134_v60 = vld [vmem:[%s2636_s1 + $0x38] sm:$0xff] }
  0x15   :  { %v135_v58 = vld [vmem:[%s2636_s1 + $0x40] sm:$0xff]  ;;  %v136_v61 = vld [vmem:[%s2636_s1 + $0x48] sm:$0xff]  ;;  %v130_v63 = vld [vmem:[%s2636_s1 + $0x18] sm:$0xff] }
  0x16   :  { %v128_v62 = vld [vmem:[%s2636_s1 + $0x8] sm:$0xff]  ;;  %v127_v0 = vld [vmem:[%s2636_s1] sm:$0xff]  ;;  %v129_v1 = vld [vmem:[%s2636_s1 + $0x10] sm:$0xff] }
  0x17   :  { %347 = vmatpush1.xpose.msra.mxu0 %v197_v22  ;;  %492 = vmatpush1.xpose.msra.mxu1 %v199_v23  ;;  %v237_v2 = vld [vmem:[%s2636_s1 + $0x370] sm:$0xff]  ;;  %v238_v3 = vld [vmem:[%s2636_s1 + $0x378] sm:$0xff]  ;;  %v15_v4 = vld [vmem:[%s2635_s0] sm:$0xff] }
  0x18   :  { %348 = vmatprep.subr.mxu0 %v191_v24  ;;  %493 = vmatprep.subr.mxu1 %v193_v25  ;;  %v17_v5 = vld [vmem:[%s2635_s0 + $0x10] sm:$0xff]  ;;  %v236_v6 = vld [vmem:[%s2636_s1 + $0x368] sm:$0xff]  ;;  %v23_v7 = vld [vmem:[%s2635_s0 + $0x40] sm:$0xff] }
  0x19   :  { %v25_v8 = vld [vmem:[%s2635_s0 + $0x50] sm:$0xff]  ;;  %v230_v9 = vld [vmem:[%s2636_s1 + $0x338] sm:$0xff]  ;;  %v231_v10 = vld [vmem:[%s2636_s1 + $0x340] sm:$0xff] }
  0x1a   :  { %v22_v11 = vld [vmem:[%s2635_s0 + $0x38] sm:$0xff]  ;;  %v24_v12 = vld [vmem:[%s2635_s0 + $0x48] sm:$0xff]  ;;  %v229_v13 = vld [vmem:[%s2636_s1 + $0x330] sm:$0xff] }
  0x1b   :  { %349 = vmatpush1.xpose.msra.mxu0 %v190_v28  ;;  %494 = vmatpush1.xpose.msra.mxu1 %v192_v29  ;;  %v30_v14 = vld [vmem:[%s2635_s0 + $0x78] sm:$0xff]  ;;  %v32_v15 = vld [vmem:[%s2635_s0 + $0x88] sm:$0xff]  ;;  %v223_v16 = vld [vmem:[%s2636_s1 + $0x300] sm:$0xff] }
  0x1c   :  { %350 = vmatprep.subr.mxu0 %v184_v30  ;;  %495 = vmatprep.subr.mxu1 %v186_v31  ;;  %v224_v17 = vld [vmem:[%s2636_s1 + $0x308] sm:$0xff]  ;;  %v29_v18 = vld [vmem:[%s2635_s0 + $0x70] sm:$0xff]  ;;  %v31_v19 = vld [vmem:[%s2635_s0 + $0x80] sm:$0xff] }
  0x1d   :  { %v222_v20 = vld [vmem:[%s2636_s1 + $0x2f8] sm:$0xff]  ;;  %v37_v21 = vld [vmem:[%s2635_s0 + $0xb0] sm:$0xff]  ;;  %v39_v22 = vld [vmem:[%s2635_s0 + $0xc0] sm:$0xff] }
  0x1e   :  { %v216_v23 = vld [vmem:[%s2636_s1 + $0x2c8] sm:$0xff]  ;;  %v217_v24 = vld [vmem:[%s2636_s1 + $0x2d0] sm:$0xff]  ;;  %v38_v26 = vld [vmem:[%s2635_s0 + $0xb8] sm:$0xff] }
  0x1f   :  { %351 = vmatpush1.xpose.msra.mxu0 %v183_v32  ;;  %496 = vmatpush1.xpose.msra.mxu1 %v185_v33  ;;  %v36_v25 = vld [vmem:[%s2635_s0 + $0xa8] sm:$0xff] }
  0x20   :  { %352 = vmatprep.subr.mxu0 %v177_v34  ;;  %497 = vmatprep.subr.mxu1 %v179_v35 }
  0x23   :  { %353 = vmatpush1.xpose.msra.mxu0 %v176_v36  ;;  %498 = vmatpush1.xpose.msra.mxu1 %v178_v37 }
  0x24   :  { %354 = vmatprep.subr.mxu0 %v170_v38  ;;  %499 = vmatprep.subr.mxu1 %v172_v39 }
  0x27   :  { %355 = vmatpush1.xpose.msra.mxu0 %v169_v40  ;;  %500 = vmatpush1.xpose.msra.mxu1 %v171_v41 }
  0x28   :  { %356 = vmatprep.subr.mxu0 %v163_v42  ;;  %501 = vmatprep.subr.mxu1 %v165_v43 }
  0x2b   :  { %357 = vmatpush1.xpose.msra.mxu0 %v162_v44  ;;  %502 = vmatpush1.xpose.msra.mxu1 %v164_v45 }
  0x2c   :  { %358 = vmatprep.subr.mxu0 %v156_v46  ;;  %503 = vmatprep.subr.mxu1 %v158_v47 }
  0x2f   :  { %359 = vmatpush1.xpose.msra.mxu0 %v155_v48  ;;  %504 = vmatpush1.xpose.msra.mxu1 %v157_v49 }
  0x30   :  { %360 = vmatprep.subr.mxu0 %v149_v50  ;;  %505 = vmatprep.subr.mxu1 %v151_v51 }
  0x33   :  { %361 = vmatpush1.xpose.msra.mxu0 %v148_v52  ;;  %506 = vmatpush1.xpose.msra.mxu1 %v150_v53 }
  0x34   :  { %362 = vmatprep.subr.mxu0 %v142_v54  ;;  %507 = vmatprep.subr.mxu1 %v144_v55 }
  0x37   :  { %363 = vmatpush1.xpose.msra.mxu0 %v141_v56  ;;  %508 = vmatpush1.xpose.msra.mxu1 %v143_v57 }
  0x38   :  { %364 = vmatprep.subr.mxu0 %v135_v58  ;;  %509 = vmatprep.subr.mxu1 %v137_v59 }
  0x3b   :  { %365 = vmatpush1.xpose.msra.mxu0 %v134_v60  ;;  %510 = vmatpush1.xpose.msra.mxu1 %v136_v61 }
  0x3c   :  { %366 = vmatprep.subr.mxu0 %v128_v62  ;;  %511 = vmatprep.subr.mxu1 %v130_v63 }
  0x3f   :  { %367 = vmatpush1.xpose.msra.mxu0 %v127_v0  ;;  %512 = vmatpush1.xpose.msra.mxu1 %v129_v1 }
  0x40   :  { %626 = vmatprep.subr.mxu0 %v237_v2  ;;  %1400 = vmatprep.subr.msk.mxu1 %vm239_vm0, %v238_v3 }
  0x42   :  { %401 = vmatmul.mubr.f32.vlgmr.msra.gmra.mxu0 %v15_v4  ;;  %546 = vmatmul.mubr.f32.vlgmr.msra.gmra.mxu1 %v17_v5 }
  0x43   :  { %627 = vmatpush1.xpose.msra.mxu0 %v236_v6  ;;  %1401 = vmatpush3.xpose.msk.msra.mxu1 %vm239_vm0, %v238_v3 }
  0x44   :  { %405 = vmatprep.mubr.f32.mxu0 %v23_v7  ;;  %550 = vmatprep.mubr.f32.mxu1 %v25_v8 }
  0x45   :  { %628 = vmatprep.subr.mxu0 %v230_v9  ;;  %1402 = vmatprep.subr.msk.mxu1 %vm239_vm0, %v231_v10 }
  0x46   :  { %406 = vmatmul.mubr.f32.gmra.mxu0 %v22_v11  ;;  %551 = vmatmul.mubr.f32.gmra.mxu1 %v24_v12 }
  0x47   :  { %629 = vmatpush1.xpose.msra.mxu0 %v229_v13  ;;  %1403 = vmatpush3.xpose.msk.msra.mxu1 %vm239_vm0, %v231_v10 }
  0x48   :  { %410 = vmatprep.mubr.f32.mxu0 %v30_v14  ;;  %555 = vmatprep.mubr.f32.mxu1 %v32_v15 }
  0x49   :  { %630 = vmatprep.subr.mxu0 %v223_v16  ;;  %1404 = vmatprep.subr.msk.mxu1 %vm239_vm0, %v224_v17 }
  0x4a   :  { %411 = vmatmul.mubr.f32.gmra.mxu0 %v29_v18  ;;  %556 = vmatmul.mubr.f32.gmra.mxu1 %v31_v19 }
  0x4b   :  { %631 = vmatpush1.xpose.msra.mxu0 %v222_v20  ;;  %1405 = vmatpush3.xpose.msk.msra.mxu1 %vm239_vm0, %v224_v17 }
  0x4c   :  { %8 = vsyncpa [#allocation3], 0  ;;  %415 = vmatprep.mubr.f32.mxu0 %v37_v21  ;;  %560 = vmatprep.mubr.f32.mxu1 %v39_v22  ;;  %v215_v27 = vld [vmem:[%s2636_s1 + $0x2c0] sm:$0xff]  ;;  %v44_v28 = vld [vmem:[%s2635_s0 + $0xe8] sm:$0xff] }
  0x4d   :  { %632 = vmatprep.subr.mxu0 %v216_v23  ;;  %1406 = vmatprep.subr.msk.mxu1 %vm239_vm0, %v217_v24  ;;  %v46_v29 = vld [vmem:[%s2635_s0 + $0xf8] sm:$0xff]  ;;  %v209_v30 = vld [vmem:[%s2636_s1 + $0x290] sm:$0xff]  ;;  %v43_v32 = vld [vmem:[%s2635_s0 + $0xe0] sm:$0xff] }
  0x4e   :  { %416 = vmatmul.mubr.f32.gmra.mxu0 %v36_v25  ;;  %561 = vmatmul.mubr.f32.gmra.mxu1 %v38_v26  ;;  %v210_v31 = vld [vmem:[%s2636_s1 + $0x298] sm:$0xff]  ;;  %v45_v33 = vld [vmem:[%s2635_s0 + $0xf0] sm:$0xff]  ;;  %v208_v34 = vld [vmem:[%s2636_s1 + $0x288] sm:$0xff] }
  0x4f   :  { %633 = vmatpush1.xpose.msra.mxu0 %v215_v27  ;;  %1407 = vmatpush3.xpose.msk.msra.mxu1 %vm239_vm0, %v217_v24  ;;  %v51_v35 = vld [vmem:[%s2635_s0 + $0x120] sm:$0xff]  ;;  %v53_v36 = vld [vmem:[%s2635_s0 + $0x130] sm:$0xff]  ;;  %v202_v37 = vld [vmem:[%s2636_s1 + $0x258] sm:$0xff] }
  0x50   :  { %420 = vmatprep.mubr.f32.mxu0 %v44_v28  ;;  %565 = vmatprep.mubr.f32.mxu1 %v46_v29  ;;  %v203_v38 = vld [vmem:[%s2636_s1 + $0x260] sm:$0xff]  ;;  %v50_v39 = vld [vmem:[%s2635_s0 + $0x118] sm:$0xff]  ;;  %v52_v40 = vld [vmem:[%s2635_s0 + $0x128] sm:$0xff] }
  0x51   :  { %634 = vmatprep.subr.mxu0 %v209_v30  ;;  %1408 = vmatprep.subr.msk.mxu1 %vm239_vm0, %v210_v31  ;;  %v201_v41 = vld [vmem:[%s2636_s1 + $0x250] sm:$0xff]  ;;  %v58_v42 = vld [vmem:[%s2635_s0 + $0x158] sm:$0xff]  ;;  %v60_v43 = vld [vmem:[%s2635_s0 + $0x168] sm:$0xff] }
  0x52   :  { %421 = vmatmul.mubr.f32.gmra.mxu0 %v43_v32  ;;  %566 = vmatmul.mubr.f32.gmra.mxu1 %v45_v33  ;;  %v195_v44 = vld [vmem:[%s2636_s1 + $0x220] sm:$0xff]  ;;  %v196_v45 = vld [vmem:[%s2636_s1 + $0x228] sm:$0xff]  ;;  %v57_v46 = vld [vmem:[%s2635_s0 + $0x150] sm:$0xff] }
  0x53   :  { %635 = vmatpush1.xpose.msra.mxu0 %v208_v34  ;;  %1409 = vmatpush3.xpose.msk.msra.mxu1 %vm239_vm0, %v210_v31  ;;  %v59_v47 = vld [vmem:[%s2635_s0 + $0x160] sm:$0xff]  ;;  %v194_v48 = vld [vmem:[%s2636_s1 + $0x218] sm:$0xff]  ;;  %v65_v49 = vld [vmem:[%s2635_s0 + $0x190] sm:$0xff] }
  0x54   :  { %425 = vmatprep.mubr.f32.mxu0 %v51_v35  ;;  %570 = vmatprep.mubr.f32.mxu1 %v53_v36  ;;  %v67_v50 = vld [vmem:[%s2635_s0 + $0x1a0] sm:$0xff]  ;;  %v188_v51 = vld [vmem:[%s2636_s1 + $0x1e8] sm:$0xff]  ;;  %v189_v52 = vld [vmem:[%s2636_s1 + $0x1f0] sm:$0xff] }
  0x55   :  { %636 = vmatprep.subr.mxu0 %v202_v37  ;;  %1410 = vmatprep.subr.msk.mxu1 %vm239_vm0, %v203_v38  ;;  %v64_v53 = vld [vmem:[%s2635_s0 + $0x188] sm:$0xff]  ;;  %v66_v54 = vld [vmem:[%s2635_s0 + $0x198] sm:$0xff]  ;;  %v187_v55 = vld [vmem:[%s2636_s1 + $0x1e0] sm:$0xff] }
  0x56   :  { %426 = vmatmul.mubr.f32.gmra.mxu0 %v50_v39  ;;  %571 = vmatmul.mubr.f32.gmra.mxu1 %v52_v40  ;;  %v72_v56 = vld [vmem:[%s2635_s0 + $0x1c8] sm:$0xff]  ;;  %v74_v57 = vld [vmem:[%s2635_s0 + $0x1d8] sm:$0xff]  ;;  %v181_v58 = vld [vmem:[%s2636_s1 + $0x1b0] sm:$0xff] }
  0x57   :  { %637 = vmatpush1.xpose.msra.mxu0 %v201_v41  ;;  %1411 = vmatpush3.xpose.msk.msra.mxu1 %vm239_vm0, %v203_v38  ;;  %v182_v59 = vld [vmem:[%s2636_s1 + $0x1b8] sm:$0xff]  ;;  %v71_v60 = vld [vmem:[%s2635_s0 + $0x1c0] sm:$0xff]  ;;  %v73_v61 = vld [vmem:[%s2635_s0 + $0x1d0] sm:$0xff] }
  0x58   :  { %430 = vmatprep.mubr.f32.mxu0 %v58_v42  ;;  %575 = vmatprep.mubr.f32.mxu1 %v60_v43  ;;  %v180_v62 = vld [vmem:[%s2636_s1 + $0x1a8] sm:$0xff]  ;;  %v79_v63 = vld [vmem:[%s2635_s0 + $0x200] sm:$0xff]  ;;  %v81_v0 = vld [vmem:[%s2635_s0 + $0x210] sm:$0xff] }
  0x59   :  { %638 = vmatprep.subr.mxu0 %v195_v44  ;;  %1412 = vmatprep.subr.msk.mxu1 %vm239_vm0, %v196_v45  ;;  %v174_v1 = vld [vmem:[%s2636_s1 + $0x178] sm:$0xff]  ;;  %v175_v2 = vld [vmem:[%s2636_s1 + $0x180] sm:$0xff]  ;;  %v80_v4 = vld [vmem:[%s2635_s0 + $0x208] sm:$0xff] }
  0x5a   :  { %431 = vmatmul.mubr.f32.gmra.mxu0 %v57_v46  ;;  %576 = vmatmul.mubr.f32.gmra.mxu1 %v59_v47  ;;  %v78_v3 = vld [vmem:[%s2635_s0 + $0x1f8] sm:$0xff]  ;;  %v173_v5 = vld [vmem:[%s2636_s1 + $0x170] sm:$0xff]  ;;  %v88_v7 = vld [vmem:[%s2635_s0 + $0x248] sm:$0xff] }
  0x5b   :  { %639 = vmatpush1.xpose.msra.mxu0 %v194_v48  ;;  %1413 = vmatpush3.xpose.msk.msra.mxu1 %vm239_vm0, %v196_v45  ;;  %v86_v6 = vld [vmem:[%s2635_s0 + $0x238] sm:$0xff]  ;;  %v167_v8 = vld [vmem:[%s2636_s1 + $0x140] sm:$0xff]  ;;  %v168_v9 = vld [vmem:[%s2636_s1 + $0x148] sm:$0xff] }
  0x5c   :  { %435 = vmatprep.mubr.f32.mxu0 %v65_v49  ;;  %580 = vmatprep.mubr.f32.mxu1 %v67_v50  ;;  %v85_v10 = vld [vmem:[%s2635_s0 + $0x230] sm:$0xff]  ;;  %v87_v11 = vld [vmem:[%s2635_s0 + $0x240] sm:$0xff]  ;;  %v166_v12 = vld [vmem:[%s2636_s1 + $0x138] sm:$0xff] }
  0x5d   :  { %640 = vmatprep.subr.mxu0 %v188_v51  ;;  %1414 = vmatprep.subr.msk.mxu1 %vm239_vm0, %v189_v52  ;;  %v93_v13 = vld [vmem:[%s2635_s0 + $0x270] sm:$0xff]  ;;  %v95_v14 = vld [vmem:[%s2635_s0 + $0x280] sm:$0xff]  ;;  %v160_v15 = vld [vmem:[%s2636_s1 + $0x108] sm:$0xff] }
  0x5e   :  { %436 = vmatmul.mubr.f32.gmra.mxu0 %v64_v53  ;;  %581 = vmatmul.mubr.f32.gmra.mxu1 %v66_v54  ;;  %v161_v16 = vld [vmem:[%s2636_s1 + $0x110] sm:$0xff]  ;;  %v92_v17 = vld [vmem:[%s2635_s0 + $0x268] sm:$0xff]  ;;  %v94_v18 = vld [vmem:[%s2635_s0 + $0x278] sm:$0xff] }
  0x5f   :  { %641 = vmatpush1.xpose.msra.mxu0 %v187_v55  ;;  %1415 = vmatpush3.xpose.msk.msra.mxu1 %vm239_vm0, %v189_v52  ;;  %v159_v19 = vld [vmem:[%s2636_s1 + $0x100] sm:$0xff]  ;;  %v100_v20 = vld [vmem:[%s2635_s0 + $0x2a8] sm:$0xff]  ;;  %v102_v21 = vld [vmem:[%s2635_s0 + $0x2b8] sm:$0xff] }
  0x60   :  { %440 = vmatprep.mubr.f32.mxu0 %v72_v56  ;;  %585 = vmatprep.mubr.f32.mxu1 %v74_v57  ;;  %v153_v22 = vld [vmem:[%s2636_s1 + $0xd0] sm:$0xff]  ;;  %v154_v23 = vld [vmem:[%s2636_s1 + $0xd8] sm:$0xff]  ;;  %v99_v24 = vld [vmem:[%s2635_s0 + $0x2a0] sm:$0xff] }
  0x61   :  { %642 = vmatprep.subr.mxu0 %v181_v58  ;;  %1416 = vmatprep.subr.msk.mxu1 %vm239_vm0, %v182_v59  ;;  %v101_v25 = vld [vmem:[%s2635_s0 + $0x2b0] sm:$0xff]  ;;  %v152_v26 = vld [vmem:[%s2636_s1 + $0xc8] sm:$0xff]  ;;  %v107_v27 = vld [vmem:[%s2635_s0 + $0x2e0] sm:$0xff] }
  0x62   :  { %441 = vmatmul.mubr.f32.gmra.mxu0 %v71_v60  ;;  %586 = vmatmul.mubr.f32.gmra.mxu1 %v73_v61  ;;  %v109_v28 = vld [vmem:[%s2635_s0 + $0x2f0] sm:$0xff]  ;;  %v146_v29 = vld [vmem:[%s2636_s1 + $0x98] sm:$0xff]  ;;  %v147_v30 = vld [vmem:[%s2636_s1 + $0xa0] sm:$0xff] }
  0x63   :  { %643 = vmatpush1.xpose.msra.mxu0 %v180_v62  ;;  %1417 = vmatpush3.xpose.msk.msra.mxu1 %vm239_vm0, %v182_v59  ;;  %v106_v31 = vld [vmem:[%s2635_s0 + $0x2d8] sm:$0xff]  ;;  %v108_v32 = vld [vmem:[%s2635_s0 + $0x2e8] sm:$0xff]  ;;  %v145_v33 = vld [vmem:[%s2636_s1 + $0x90] sm:$0xff] }
  0x64   :  { %445 = vmatprep.mubr.f32.mxu0 %v79_v63  ;;  %590 = vmatprep.mubr.f32.mxu1 %v81_v0  ;;  %v114_v34 = vld [vmem:[%s2635_s0 + $0x318] sm:$0xff]  ;;  %v116_v35 = vld [vmem:[%s2635_s0 + $0x328] sm:$0xff]  ;;  %v139_v36 = vld [vmem:[%s2636_s1 + $0x60] sm:$0xff] }
  0x65   :  { %644 = vmatprep.subr.mxu0 %v174_v1  ;;  %1418 = vmatprep.subr.msk.mxu1 %vm239_vm0, %v175_v2  ;;  %v140_v37 = vld [vmem:[%s2636_s1 + $0x68] sm:$0xff]  ;;  %v113_v38 = vld [vmem:[%s2635_s0 + $0x310] sm:$0xff]  ;;  %v115_v39 = vld [vmem:[%s2635_s0 + $0x320] sm:$0xff] }
  0x66   :  { %446 = vmatmul.mubr.f32.gmra.mxu0 %v78_v3  ;;  %591 = vmatmul.mubr.f32.gmra.mxu1 %v80_v4  ;;  %v138_v40 = vld [vmem:[%s2636_s1 + $0x58] sm:$0xff]  ;;  %v121_v41 = vld [vmem:[%s2635_s0 + $0x350] sm:$0xff]  ;;  %v123_v42 = vld [vmem:[%s2635_s0 + $0x360] sm:$0xff] }
  0x67   :  { %645 = vmatpush1.xpose.msra.mxu0 %v173_v5  ;;  %1419 = vmatpush3.xpose.msk.msra.mxu1 %vm239_vm0, %v175_v2  ;;  %v132_v43 = vld [vmem:[%s2636_s1 + $0x28] sm:$0xff]  ;;  %v133_v44 = vld [vmem:[%s2636_s1 + $0x30] sm:$0xff]  ;;  %v122_v46 = vld [vmem:[%s2635_s0 + $0x358] sm:$0xff] }
  0x68   :  { %450 = vmatprep.mubr.f32.mxu0 %v86_v6  ;;  %595 = vmatprep.mubr.f32.mxu1 %v88_v7  ;;  %v120_v45 = vld [vmem:[%s2635_s0 + $0x348] sm:$0xff]  ;;  %v131_v47 = vld [vmem:[%s2636_s1 + $0x20] sm:$0xff]  ;;  %v21_v49 = vld [vmem:[%s2635_s0 + $0x30] sm:$0xff] }
  0x69   :  { %646 = vmatprep.subr.mxu0 %v167_v8  ;;  %1420 = vmatprep.subr.msk.mxu1 %vm239_vm0, %v168_v9  ;;  %v20_v48 = vld [vmem:[%s2635_s0 + $0x28] sm:$0xff]  ;;  %v19_v50 = vld [vmem:[%s2635_s0 + $0x20] sm:$0xff]  ;;  %v26_v54 = vld [vmem:[%s2635_s0 + $0x58] sm:$0xff] }
  0x6a   :  { %451 = vmatmul.mubr.f32.gmra.mxu0 %v85_v10  ;;  %596 = vmatmul.mubr.f32.gmra.mxu1 %v87_v11  ;;  %v28_v51 = vld [vmem:[%s2635_s0 + $0x68] sm:$0xff]  ;;  %v27_v52 = vld [vmem:[%s2635_s0 + $0x60] sm:$0xff]  ;;  %v42_v55 = vld [vmem:[%s2635_s0 + $0xd8] sm:$0xff] }
  0x6b   :  { %647 = vmatpush1.xpose.msra.mxu0 %v166_v12  ;;  %1421 = vmatpush3.xpose.msk.msra.mxu1 %vm239_vm0, %v168_v9  ;;  %v35_v53 = vld [vmem:[%s2635_s0 + $0xa0] sm:$0xff]  ;;  %v34_v56 = vld [vmem:[%s2635_s0 + $0x98] sm:$0xff]  ;;  %v49_v57 = vld [vmem:[%s2635_s0 + $0x110] sm:$0xff] }
  0x6c   :  { %455 = vmatprep.mubr.f32.mxu0 %v93_v13  ;;  %600 = vmatprep.mubr.f32.mxu1 %v95_v14  ;;  %v33_v58 = vld [vmem:[%s2635_s0 + $0x90] sm:$0xff]  ;;  %v56_v59 = vld [vmem:[%s2635_s0 + $0x148] sm:$0xff]  ;;  %v63_v61 = vld [vmem:[%s2635_s0 + $0x180] sm:$0xff] }
  0x6d   :  { %648 = vmatprep.subr.mxu0 %v160_v15  ;;  %1422 = vmatprep.subr.msk.mxu1 %vm239_vm0, %v161_v16  ;;  %v41_v60 = vld [vmem:[%s2635_s0 + $0xd0] sm:$0xff]  ;;  %v40_v62 = vld [vmem:[%s2635_s0 + $0xc8] sm:$0xff]  ;;  %v70_v63 = vld [vmem:[%s2635_s0 + $0x1b8] sm:$0xff] }
  0x6e   :  { %456 = vmatmul.mubr.f32.gmra.mxu0 %v92_v17  ;;  %601 = vmatmul.mubr.f32.gmra.mxu1 %v94_v18  ;;  %v48_v0 = vld [vmem:[%s2635_s0 + $0x108] sm:$0xff]  ;;  %v77_v1 = vld [vmem:[%s2635_s0 + $0x1f0] sm:$0xff]  ;;  %v947_v2 = vld [vmem:[%s2637_s2 + $0x78] sm:$0xff] }
  0x6f   :  { %649 = vmatpush1.xpose.msra.mxu0 %v159_v19  ;;  %1423 = vmatpush3.xpose.msk.msra.mxu1 %vm239_vm0, %v161_v16  ;;  %v47_v3 = vld [vmem:[%s2635_s0 + $0x100] sm:$0xff]  ;;  %v84_v4 = vld [vmem:[%s2635_s0 + $0x228] sm:$0xff]  ;;  %v946_v7 = vld [vmem:[%s2637_s2 + $0x70] sm:$0xff] }
  0x70   :  { %460 = vmatprep.mubr.f32.mxu0 %v100_v20  ;;  %605 = vmatprep.mubr.f32.mxu1 %v102_v21  ;;  %v55_v5 = vld [vmem:[%s2635_s0 + $0x140] sm:$0xff]  ;;  %v54_v8 = vld [vmem:[%s2635_s0 + $0x138] sm:$0xff]  ;;  %v105_v11 = vld [vmem:[%s2635_s0 + $0x2d0] sm:$0xff] }
  0x71   :  { %650 = vmatprep.subr.mxu0 %v153_v22  ;;  %1424 = vmatprep.subr.msk.mxu1 %vm239_vm0, %v154_v23  ;;  %v91_v6 = vld [vmem:[%s2635_s0 + $0x260] sm:$0xff]  ;;  %v98_v9 = vld [vmem:[%s2635_s0 + $0x298] sm:$0xff]  ;;  %v945_v12 = vld [vmem:[%s2637_s2 + $0x68] sm:$0xff] }
  0x72   :  { %461 = vmatmul.mubr.f32.gmra.mxu0 %v99_v24  ;;  %606 = vmatmul.mubr.f32.gmra.mxu1 %v101_v25  ;;  %v62_v10 = vld [vmem:[%s2635_s0 + $0x178] sm:$0xff]  ;;  %v61_v13 = vld [vmem:[%s2635_s0 + $0x170] sm:$0xff]  ;;  %v112_v14 = vld [vmem:[%s2635_s0 + $0x308] sm:$0xff] }
  0x73   :  { %651 = vmatpush1.xpose.msra.mxu0 %v152_v26  ;;  %1425 = vmatpush3.xpose.msk.msra.mxu1 %vm239_vm0, %v154_v23  ;;  %v69_v15 = vld [vmem:[%s2635_s0 + $0x1b0] sm:$0xff]  ;;  %v119_v16 = vld [vmem:[%s2635_s0 + $0x340] sm:$0xff]  ;;  %v68_v18 = vld [vmem:[%s2635_s0 + $0x1a8] sm:$0xff] }
  0x74   :  { %465 = vmatprep.mubr.f32.mxu0 %v107_v27  ;;  %610 = vmatprep.mubr.f32.mxu1 %v109_v28  ;;  %v944_v17 = vld [vmem:[%s2637_s2 + $0x60] sm:$0xff]  ;;  %v126_v19 = vld [vmem:[%s2635_s0 + $0x378] sm:$0xff]  ;;  %v76_v20 = vld [vmem:[%s2635_s0 + $0x1e8] sm:$0xff] }
  0x75   :  { %652 = vmatprep.subr.mxu0 %v146_v29  ;;  %1426 = vmatprep.subr.msk.mxu1 %vm239_vm0, %v147_v30  ;;  %v943_v21 = vld [vmem:[%s2637_s2 + $0x58] sm:$0xff]  ;;  %v75_v22 = vld [vmem:[%s2635_s0 + $0x1e0] sm:$0xff]  ;;  %v942_v24 = vld [vmem:[%s2637_s2 + $0x50] sm:$0xff] }
  0x76   :  { %466 = vmatmul.mubr.f32.gmra.mxu0 %v106_v31  ;;  %611 = vmatmul.mubr.f32.gmra.mxu1 %v108_v32  ;;  %v83_v23 = vld [vmem:[%s2635_s0 + $0x220] sm:$0xff]  ;;  %v82_v25 = vld [vmem:[%s2635_s0 + $0x218] sm:$0xff]  ;;  %v941_v27 = vld [vmem:[%s2637_s2 + $0x48] sm:$0xff] }
  0x77   :  { %653 = vmatpush1.xpose.msra.mxu0 %v145_v33  ;;  %1427 = vmatpush3.xpose.msk.msra.mxu1 %vm239_vm0, %v147_v30  ;;  %v90_v26 = vld [vmem:[%s2635_s0 + $0x258] sm:$0xff]  ;;  %v89_v28 = vld [vmem:[%s2635_s0 + $0x250] sm:$0xff]  ;;  %v940_v30 = vld [vmem:[%s2637_s2 + $0x40] sm:$0xff] }
  0x78   :  { %470 = vmatprep.mubr.f32.mxu0 %v114_v34  ;;  %615 = vmatprep.mubr.f32.mxu1 %v116_v35  ;;  %v97_v29 = vld [vmem:[%s2635_s0 + $0x290] sm:$0xff]  ;;  %v96_v31 = vld [vmem:[%s2635_s0 + $0x288] sm:$0xff]  ;;  %v939_v33 = vld [vmem:[%s2637_s2 + $0x38] sm:$0xff] }
  0x79   :  { %654 = vmatprep.subr.mxu0 %v139_v36  ;;  %1428 = vmatprep.subr.msk.mxu1 %vm239_vm0, %v140_v37  ;;  %v104_v32 = vld [vmem:[%s2635_s0 + $0x2c8] sm:$0xff]  ;;  %v103_v34 = vld [vmem:[%s2635_s0 + $0x2c0] sm:$0xff]  ;;  %v938_v36 = vld [vmem:[%s2637_s2 + $0x30] sm:$0xff] }
  0x7a   :  { %471 = vmatmul.mubr.f32.gmra.mxu0 %v113_v38  ;;  %616 = vmatmul.mubr.f32.gmra.mxu1 %v115_v39  ;;  %v111_v35 = vld [vmem:[%s2635_s0 + $0x300] sm:$0xff]  ;;  %v118_v38 = vld [vmem:[%s2635_s0 + $0x338] sm:$0xff]  ;;  %v937_v39 = vld [vmem:[%s2637_s2 + $0x28] sm:$0xff] }
  0x7b   :  { %655 = vmatpush1.xpose.msra.mxu0 %v138_v40  ;;  %1429 = vmatpush3.xpose.msk.msra.mxu1 %vm239_vm0, %v140_v37  ;;  %v110_v37 = vld [vmem:[%s2635_s0 + $0x2f8] sm:$0xff]  ;;  %v117_v40 = vld [vmem:[%s2635_s0 + $0x330] sm:$0xff] }
  0x7c   :  { %475 = vmatprep.mubr.f32.mxu0 %v121_v41  ;;  %620 = vmatprep.mubr.f32.mxu1 %v123_v42  ;;  %v125_v41 = vld [vmem:[%s2635_s0 + $0x370] sm:$0xff]  ;;  %v936_v42 = vld [vmem:[%s2637_s2 + $0x20] sm:$0xff] }
  0x7d   :  { %656 = vmatprep.subr.mxu0 %v132_v43  ;;  %1430 = vmatprep.subr.msk.mxu1 %vm239_vm0, %v133_v44  ;;  %v124_v43 = vld [vmem:[%s2635_s0 + $0x368] sm:$0xff] }
  0x7e   :  { %476 = vmatmul.mubr.f32.gmra.mxu0 %v120_v45  ;;  %621 = vmatmul.mubr.f32.gmra.mxu1 %v122_v46  ;;  %v934_v45 = vld [vmem:[%s2637_s2 + $0x10] sm:$0xff]  ;;  %v933_v46 = vld [vmem:[%s2637_s2 + $0x8] sm:$0xff] }
  0x7f   :  { %657 = vmatpush1.xpose.msra.mxu0 %v131_v47  ;;  %1431 = vmatpush3.xpose.msk.msra.mxu1 %vm239_vm0, %v133_v44  ;;  %v935_v44 = vld [vmem:[%s2637_s2 + $0x18] sm:$0xff]  ;;  %v932_v47 = vld [vmem:[%s2637_s2] sm:$0xff]  ;;  %s1633_s2 = smov [#allocation2]  }
  0x80   :  { %690 = vmatprep.mubr.f32.mxu0 %v20_v48  ;;  %1432 = vmatprep.mubr.msk.f32.mxu1 %vm239_vm0, %v21_v49  ;;  %s1293_s27 = sshll.u32 %s1633_s2, 4  ;;  %s1294_s27 = int_to_ptr.vmem [resolvable:$true] %s1293_s27 }
  0x81   :  { %1456 = vmatprep.subr.mxu0 %v947_v2  ;;  %1512 = vmatprep.subr.mxu1 %v947_v2  ;;  %s1611_s28 = scalar_lea.vmem %s1294_s27, 2048  ;;  %p1616_p1 = scmp.lt.s32.totalorder %s1294_s27, %s1294_s27 }
  0x82   :  { %691 = vmatmul.mubr.f32.vlgmr.msra.gmra.mxu0 %v19_v50  ;;  %1433 = vmatmul.mubr.msk.f32.vlgmr.msra.gmra.mxu1 %vm239_vm0, %v28_v51  ;;  %p1612_p0 = scmp.ne.s32.totalorder %s1294_s27, %s1611_s28  ;;  %p1617_p2 = scmp.lt.s32.totalorder %s1611_s28, %s1611_s28 }
  0x83   :  { %695 = vmatprep.mubr.f32.mxu0 %v27_v52  ;;  %1435 = vmatprep.mubr.msk.f32.mxu1 %vm239_vm0, %v35_v53 }
  0x84   :  { %1457 = vmatpush3.xpose.msra.mxu0 %v947_v2  ;;  %1528 = vmatpush3.xpose.msra.mxu1 %v947_v2  ;;  %p1618_p3 = por %p1617_p2, %p1616_p1 }
  0x85   :  { %1458 = vmatprep.subr.mxu0 %v946_v7  ;;  %1513 = vmatprep.subr.mxu1 %v946_v7 }
  0x86   :  { %696 = vmatmul.mubr.f32.gmra.mxu0 %v26_v54  ;;  %1436 = vmatmul.mubr.msk.f32.gmra.mxu1 %vm239_vm0, %v42_v55  ;;  %p1619_p4 = pnand %p1618_p3, %p1612_p0 }
  0x87   :  { %700 = vmatprep.mubr.f32.mxu0 %v34_v56  ;;  %1438 = vmatprep.mubr.msk.f32.mxu1 %vm239_vm0, %v49_v57 }
  0x88   :  { %1459 = vmatpush3.xpose.msra.mxu0 %v946_v7  ;;  %1529 = vmatpush3.xpose.msra.mxu1 %v946_v7 }
  0x89   :  { %1460 = vmatprep.subr.mxu0 %v945_v12  ;;  %1514 = vmatprep.subr.mxu1 %v945_v12 }
  0x8a   :  { %701 = vmatmul.mubr.f32.gmra.mxu0 %v33_v58  ;;  %1439 = vmatmul.mubr.msk.f32.gmra.mxu1 %vm239_vm0, %v56_v59 }
  0x8b   :  { %705 = vmatprep.mubr.f32.mxu0 %v41_v60  ;;  %1441 = vmatprep.mubr.msk.f32.mxu1 %vm239_vm0, %v63_v61 }
  0x8c   :  { %1461 = vmatpush3.xpose.msra.mxu0 %v945_v12  ;;  %1530 = vmatpush3.xpose.msra.mxu1 %v945_v12 }
  0x8d   :  { %1462 = vmatprep.subr.mxu0 %v944_v17  ;;  %1515 = vmatprep.subr.mxu1 %v944_v17 }
  0x8e   :  { %706 = vmatmul.mubr.f32.gmra.mxu0 %v40_v62  ;;  %1442 = vmatmul.mubr.msk.f32.gmra.mxu1 %vm239_vm0, %v70_v63 }
  0x8f   :  { %710 = vmatprep.mubr.f32.mxu0 %v48_v0  ;;  %1444 = vmatprep.mubr.msk.f32.mxu1 %vm239_vm0, %v77_v1 }
  0x90   :  { %1463 = vmatpush3.xpose.msra.mxu0 %v944_v17  ;;  %1531 = vmatpush3.xpose.msra.mxu1 %v944_v17 }
  0x91   :  { %1464 = vmatprep.subr.mxu0 %v943_v21  ;;  %1516 = vmatprep.subr.mxu1 %v943_v21 }
  0x92   :  { %711 = vmatmul.mubr.f32.gmra.mxu0 %v47_v3  ;;  %1445 = vmatmul.mubr.msk.f32.gmra.mxu1 %vm239_vm0, %v84_v4 }
  0x93   :  { %715 = vmatprep.mubr.f32.mxu0 %v55_v5  ;;  %1447 = vmatprep.mubr.msk.f32.mxu1 %vm239_vm0, %v91_v6 }
  0x94   :  { %1465 = vmatpush3.xpose.msra.mxu0 %v943_v21  ;;  %1532 = vmatpush3.xpose.msra.mxu1 %v943_v21 }
  0x95   :  { %1466 = vmatprep.subr.mxu0 %v942_v24  ;;  %1517 = vmatprep.subr.mxu1 %v942_v24 }
  0x96   :  { %716 = vmatmul.mubr.f32.gmra.mxu0 %v54_v8  ;;  %1448 = vmatmul.mubr.msk.f32.gmra.mxu1 %vm239_vm0, %v98_v9 }
  0x97   :  { %720 = vmatprep.mubr.f32.mxu0 %v62_v10  ;;  %1450 = vmatprep.mubr.msk.f32.mxu1 %vm239_vm0, %v105_v11 }
  0x98   :  { %1467 = vmatpush3.xpose.msra.mxu0 %v942_v24  ;;  %1533 = vmatpush3.xpose.msra.mxu1 %v942_v24 }
  0x99   :  { %1468 = vmatprep.subr.mxu0 %v941_v27  ;;  %1518 = vmatprep.subr.mxu1 %v941_v27 }
  0x9a   :  { %721 = vmatmul.mubr.f32.gmra.mxu0 %v61_v13  ;;  %1451 = vmatmul.mubr.msk.f32.gmra.mxu1 %vm239_vm0, %v112_v14 }
  0x9b   :  { %725 = vmatprep.mubr.f32.mxu0 %v69_v15  ;;  %1453 = vmatprep.mubr.msk.f32.mxu1 %vm239_vm0, %v119_v16 }
  0x9c   :  { %1469 = vmatpush3.xpose.msra.mxu0 %v941_v27  ;;  %1534 = vmatpush3.xpose.msra.mxu1 %v941_v27 }
  0x9d   :  { %1470 = vmatprep.subr.mxu0 %v940_v30  ;;  %1519 = vmatprep.subr.mxu1 %v940_v30 }
  0x9e   :  { %726 = vmatmul.mubr.f32.gmra.mxu0 %v68_v18  ;;  %1454 = vmatmul.mubr.msk.f32.gmra.mxu1 %vm239_vm0, %v126_v19 }
  0x9f   :  { %730 = vmatprep.mubr.f32.mxu0 %v76_v20 }
  0xa0   :  { %1471 = vmatpush3.xpose.msra.mxu0 %v940_v30  ;;  %1535 = vmatpush3.xpose.msra.mxu1 %v940_v30 }
  0xa1   :  { %1472 = vmatprep.subr.mxu0 %v939_v33  ;;  %1520 = vmatprep.subr.mxu1 %v939_v33 }
  0xa2   :  { %731 = vmatmul.mubr.f32.gmra.mxu0 %v75_v22 }
  0xa3   :  { %735 = vmatprep.mubr.f32.mxu0 %v83_v23 }
  0xa4   :  { %1473 = vmatpush3.xpose.msra.mxu0 %v939_v33  ;;  %1536 = vmatpush3.xpose.msra.mxu1 %v939_v33 }
  0xa5   :  { %1474 = vmatprep.subr.mxu0 %v938_v36  ;;  %1521 = vmatprep.subr.mxu1 %v938_v36 }
  0xa6   :  { %736 = vmatmul.mubr.f32.gmra.mxu0 %v82_v25 }
  0xa7   :  { %740 = vmatprep.mubr.f32.mxu0 %v90_v26 }
  0xa8   :  { %1475 = vmatpush3.xpose.msra.mxu0 %v938_v36  ;;  %1537 = vmatpush3.xpose.msra.mxu1 %v938_v36 }
  0xa9   :  { %1476 = vmatprep.subr.mxu0 %v937_v39  ;;  %1522 = vmatprep.subr.mxu1 %v937_v39 }
  0xaa   :  { %741 = vmatmul.mubr.f32.gmra.mxu0 %v89_v28 }
  0xab   :  { %745 = vmatprep.mubr.f32.mxu0 %v97_v29 }
  0xac   :  { %1477 = vmatpush3.xpose.msra.mxu0 %v937_v39  ;;  %1538 = vmatpush3.xpose.msra.mxu1 %v937_v39 }
  0xad   :  { %1478 = vmatprep.subr.mxu0 %v936_v42  ;;  %1523 = vmatprep.subr.mxu1 %v936_v42 }
  0xae   :  { %746 = vmatmul.mubr.f32.gmra.mxu0 %v96_v31 }
  0xaf   :  { %750 = vmatprep.mubr.f32.mxu0 %v104_v32 }
  0xb0   :  { %1479 = vmatpush3.xpose.msra.mxu0 %v936_v42  ;;  %1539 = vmatpush3.xpose.msra.mxu1 %v936_v42 }
  0xb1   :  { %1480 = vmatprep.subr.mxu0 %v935_v44  ;;  %1524 = vmatprep.subr.mxu1 %v935_v44 }
  0xb2   :  { %751 = vmatmul.mubr.f32.gmra.mxu0 %v103_v34 }
  0xb3   :  { %755 = vmatprep.mubr.f32.mxu0 %v111_v35 }
  0xb4   :  { %1481 = vmatpush3.xpose.msra.mxu0 %v935_v44  ;;  %1540 = vmatpush3.xpose.msra.mxu1 %v935_v44 }
  0xb5   :  { %1482 = vmatprep.subr.mxu0 %v934_v45  ;;  %1525 = vmatprep.subr.mxu1 %v934_v45 }
  0xb6   :  { %756 = vmatmul.mubr.f32.gmra.mxu0 %v110_v37 }
  0xb7   :  { %760 = vmatprep.mubr.f32.mxu0 %v118_v38 }
  0xb8   :  { %1483 = vmatpush3.xpose.msra.mxu0 %v934_v45  ;;  %1541 = vmatpush3.xpose.msra.mxu1 %v934_v45 }
  0xb9   :  { %1484 = vmatprep.subr.mxu0 %v933_v46  ;;  %1526 = vmatprep.subr.mxu1 %v933_v46 }
  0xba   :  { %761 = vmatmul.mubr.f32.gmra.mxu0 %v117_v40 }
  0xbb   :  { %765 = vmatprep.mubr.f32.mxu0 %v125_v41 }
  0xbc   :  { %1485 = vmatpush3.xpose.msra.mxu0 %v933_v46  ;;  %1542 = vmatpush3.xpose.msra.mxu1 %v933_v46 }
  0xbd   :  { %1486 = vmatprep.subr.mxu0 %v932_v47  ;;  %1527 = vmatprep.subr.mxu1 %v932_v47 }
  0xbe   :  { %766 = vmatmul.mubr.f32.gmra.mxu0 %v124_v43 }
  0xc0   :  { %1487 = vmatpush3.xpose.msra.mxu0 %v932_v47  ;;  %1543 = vmatpush3.xpose.msra.mxu1 %v932_v47 }
 0x102   :  { %v2424_v48 = vpop.f32.mrf.mxu0  ;;  %v2426_v49 = vpop.f32.mrf.mxu1 }
 0x104   :  { %v404_v50 = vpop.f32.mrf.mxu0  ;;  %v549_v51 = vpop.f32.mrf.mxu1 }
 0x105   :  { %v548_v50 = vadd.f32 %v2426_v49, %v2424_v48 }
 0x106   :  { %v2428_v52 = vpop.f32.mrf.mxu0  ;;  %v2430_v53 = vpop.f32.mrf.mxu1 }
 0x108   :  { %v409_v54 = vpop.f32.mrf.mxu0  ;;  %v554_v55 = vpop.f32.mrf.mxu1 }
 0x10a   :  { %v2432_v56 = vpop.f32.mrf.mxu0  ;;  %v2434_v57 = vpop.f32.mrf.mxu1 }
 0x10c   :  { %v414_v58 = vpop.f32.mrf.mxu0  ;;  %v559_v59 = vpop.f32.mrf.mxu1 }
 0x10e   :  { %v2436_v60 = vpop.f32.mrf.mxu0  ;;  %v2438_v61 = vpop.f32.mrf.mxu1 }
 0x110   :  { %v419_v62 = vpop.f32.mrf.mxu0  ;;  %v564_v63 = vpop.f32.mrf.mxu1 }
 0x111   :  { %v553_v62 = vadd.f32 %v2430_v53, %v2428_v52 }
 0x112   :  { %v2440_v0 = vpop.f32.mrf.mxu0  ;;  %v2442_v1 = vpop.f32.mrf.mxu1 }
 0x114   :  { %v424_v2 = vpop.f32.mrf.mxu0  ;;  %v569_v3 = vpop.f32.mrf.mxu1 }
 0x116   :  { %v2444_v4 = vpop.f32.mrf.mxu0  ;;  %v2446_v5 = vpop.f32.mrf.mxu1 }
 0x118   :  { %v429_v6 = vpop.f32.mrf.mxu0  ;;  %v574_v7 = vpop.f32.mrf.mxu1 }
 0x11a   :  { %v2448_v8 = vpop.f32.mrf.mxu0  ;;  %v2450_v9 = vpop.f32.mrf.mxu1 }
 0x11c   :  { %v434_v10 = vpop.f32.mrf.mxu0  ;;  %v579_v11 = vpop.f32.mrf.mxu1 }
 0x11d   :  { %v558_v11 = vadd.f32 %v2434_v57, %v2432_v56  ;;  %v568_v56 = vadd.f32 %v2442_v1, %v2440_v0  ;;  %v578_v0 = vadd.f32 %v2450_v9, %v2448_v8 }
 0x11e   :  { %v2452_v12 = vpop.f32.mrf.mxu0  ;;  %v2454_v13 = vpop.f32.mrf.mxu1 }
 0x120   :  { %v439_v14 = vpop.f32.mrf.mxu0  ;;  %v584_v15 = vpop.f32.mrf.mxu1 }
 0x122   :  { %v2456_v16 = vpop.f32.mrf.mxu0  ;;  %v2458_v17 = vpop.f32.mrf.mxu1 }
 0x123   :  { %v588_v8 = vadd.f32 %v2458_v17, %v2456_v16 }
 0x124   :  { %v444_v18 = vpop.f32.mrf.mxu0  ;;  %v589_v19 = vpop.f32.mrf.mxu1 }
 0x126   :  { %v2460_v20 = vpop.f32.mrf.mxu0  ;;  %v2462_v21 = vpop.f32.mrf.mxu1 }
 0x128   :  { %v449_v22 = vpop.f32.mrf.mxu0  ;;  %v594_v23 = vpop.f32.mrf.mxu1 }
 0x129   :  { %v563_v22 = vadd.f32 %v2438_v61, %v2436_v60  ;;  %v573_v60 = vadd.f32 %v2446_v5, %v2444_v4  ;;  %v583_v4 = vadd.f32 %v2454_v13, %v2452_v12  ;;  %v593_v12 = vadd.f32 %v2462_v21, %v2460_v20 }
 0x12a   :  { %v2464_v24 = vpop.f32.mrf.mxu0  ;;  %v2466_v25 = vpop.f32.mrf.mxu1 }
 0x12b   :  { %v598_v16 = vadd.f32 %v2466_v25, %v2464_v24 }
 0x12c   :  { %v454_v26 = vpop.f32.mrf.mxu0  ;;  %v599_v27 = vpop.f32.mrf.mxu1 }
 0x12e   :  { %v2468_v28 = vpop.f32.mrf.mxu0  ;;  %v2470_v29 = vpop.f32.mrf.mxu1 }
 0x12f   :  { %v603_v20 = vadd.f32 %v2470_v29, %v2468_v28 }
 0x130   :  { %v459_v30 = vpop.f32.mrf.mxu0  ;;  %v604_v31 = vpop.f32.mrf.mxu1 }
 0x132   :  { %v2472_v32 = vpop.f32.mrf.mxu0  ;;  %v2474_v33 = vpop.f32.mrf.mxu1 }
 0x133   :  { %v608_v24 = vadd.f32 %v2474_v33, %v2472_v32 }
 0x134   :  { %v464_v34 = vpop.f32.mrf.mxu0  ;;  %v609_v35 = vpop.f32.mrf.mxu1 }
 0x136   :  { %v2476_v36 = vpop.f32.mrf.mxu0  ;;  %v2478_v37 = vpop.f32.mrf.mxu1 }
 0x137   :  { %v613_v28 = vadd.f32 %v2478_v37, %v2476_v36 }
 0x138   :  { %v469_v38 = vpop.f32.mrf.mxu0  ;;  %v614_v39 = vpop.f32.mrf.mxu1 }
 0x13a   :  { %v2480_v40 = vpop.f32.mrf.mxu0  ;;  %v2482_v41 = vpop.f32.mrf.mxu1 }
 0x13b   :  { %v618_v32 = vadd.f32 %v2482_v41, %v2480_v40  ;;  %v1093_v40 = vlaneseq }
 0x13c   :  { %v474_v42 = vpop.f32.mrf.mxu0  ;;  %v619_v43 = vpop.f32.mrf.mxu1 }
 0x13d   :  { %v1094_v41 = vand.u32 127, %v1093_v40 }
 0x13e   :  { %v2484_v44 = vpop.f32.mrf.mxu0  ;;  %v2486_v45 = vpop.f32.mrf.mxu1 }
 0x13f   :  { %v623_v36 = vadd.f32 %v2486_v45, %v2484_v44  ;;  %vm1095_vm1 = vcmp.lt.s32.totalorder %v1094_v41, 27 }
 0x140   :  { %v479_v46 = vpop.f32.mrf.mxu0  ;;  %v624_v47 = vpop.f32.mrf.mxu1 }
 0x142   :  { %v692_v51 = vpop.f32.mrf.mxu0  ;;  %v1434_v54 = vpop.f32.mrf.mxu1 }
 0x143   :  { %v693_v55 = vadd.f32 %v692_v51, %v548_v50 }
 0x144   :  { %v694_v58 = vpop.f32.mrf.mxu0  ;;  %v837_v59 = vpop.f32.mrf.mxu1 }
 0x145   :  { %v838_v63 = vadd.f32 %v837_v59, %v693_v55 }
 0x146   :  { %v697_v2 = vpop.f32.mrf.mxu0  ;;  %v1437_v3 = vpop.f32.mrf.mxu1 }
 0x147   :  { %v916_v6 = vmax.f32 %v838_v63, 0.0  ;;  %v698_v7 = vadd.f32 %v697_v2, %v553_v62 }
 0x148   :  { %v699_v10 = vpop.f32.mrf.mxu0  ;;  %v847_v49 = vpop.f32.mrf.mxu1 }
 0x149   :  { %v843_v14 = vadd.f32 %v1434_v54, %v698_v7  ;;  %1488 = vmatprep.mubr.f32.mxu0 %v916_v6 }
 0x14a   :  { %v702_v48 = vpop.f32.mrf.mxu0  ;;  %v1440_v23 = vpop.f32.mrf.mxu1 }
 0x14b   :  { %v917_v15 = vmax.f32 %v843_v14, 0.0  ;;  %v703_v18 = vadd.f32 %v702_v48, %v558_v11 }
 0x14c   :  { %v704_v19 = vpop.f32.mrf.mxu0  ;;  %v857_v34 = vpop.f32.mrf.mxu1 }
 0x14d   :  { %v848_v52 = vadd.f32 %v847_v49, %v703_v18  ;;  %1489 = vmatmul.mubr.f32.vlgmr.msra.gmra.mxu0 %v917_v15 }
 0x14e   :  { %v707_v53 = vpop.f32.mrf.mxu0  ;;  %v1443_v43 = vpop.f32.mrf.mxu1 }
 0x14f   :  { %v918_v26 = vmax.f32 %v848_v52, 0.0  ;;  %v708_v27 = vadd.f32 %v707_v53, %v563_v22 }
 0x150   :  { %v709_v30 = vpop.f32.mrf.mxu0  ;;  %v867_v54 = vpop.f32.mrf.mxu1 }
 0x151   :  { %v853_v57 = vadd.f32 %v1437_v3, %v708_v27  ;;  %1491 = vmatprep.mubr.f32.mxu0 %v918_v26 }
 0x152   :  { %v712_v31 = vpop.f32.mrf.mxu0  ;;  %v1446_v63 = vpop.f32.mrf.mxu1 }
 0x153   :  { %v919_v35 = vmax.f32 %v853_v57, 0.0  ;;  %v713_v38 = vadd.f32 %v712_v31, %v568_v56 }
 0x154   :  { %v714_v39 = vpop.f32.mrf.mxu0  ;;  %v877_v10 = vpop.f32.mrf.mxu1 }
 0x155   :  { %v858_v61 = vadd.f32 %v857_v34, %v713_v38  ;;  %1492 = vmatmul.mubr.f32.gmra.mxu0 %v919_v35 }
 0x156   :  { %v717_v42 = vpop.f32.mrf.mxu0  ;;  %v1449_v15 = vpop.f32.mrf.mxu1 }
 0x157   :  { %v920_v46 = vmax.f32 %v858_v61, 0.0  ;;  %v718_v47 = vadd.f32 %v717_v42, %v573_v60 }
 0x158   :  { %v719_v50 = vpop.f32.mrf.mxu0  ;;  %v887_v53 = vpop.f32.mrf.mxu1 }
 0x159   :  { %v863_v1 = vadd.f32 %v1440_v23, %v718_v47  ;;  %1494 = vmatprep.mubr.f32.mxu0 %v920_v46 }
 0x15a   :  { %v722_v51 = vpop.f32.mrf.mxu0  ;;  %v1452_v56 = vpop.f32.mrf.mxu1 }
 0x15b   :  { %v921_v55 = vmax.f32 %v863_v1, 0.0  ;;  %v723_v58 = vadd.f32 %v722_v51, %v578_v0 }
 0x15c   :  { %v724_v59 = vpop.f32.mrf.mxu0  ;;  %v897_v38 = vpop.f32.mrf.mxu1 }
 0x15d   :  { %v868_v5 = vadd.f32 %v867_v54, %v723_v58  ;;  %1495 = vmatmul.mubr.f32.gmra.mxu0 %v921_v55 }
 0x15e   :  { %v727_v62 = vpop.f32.mrf.mxu0 }
 0x15f   :  { %v922_v2 = vmax.f32 %v868_v5, 0.0  ;;  %v728_v3 = vadd.f32 %v727_v62, %v583_v4 }
 0x160   :  { %v729_v6 = vpop.f32.mrf.mxu0 }
 0x161   :  { %v873_v9 = vadd.f32 %v1443_v43, %v728_v3  ;;  %1497 = vmatprep.mubr.f32.mxu0 %v922_v2  ;;  %v1455_v43 = vpop.f32.mrf.mxu1 }
 0x162   :  { %v732_v7 = vpop.f32.mrf.mxu0 }
 0x163   :  { %v923_v11 = vmax.f32 %v873_v9, 0.0  ;;  %v733_v14 = vadd.f32 %v732_v7, %v588_v8  ;;  %v907_v1 = vpop.f32.mrf.mxu1 }
 0x164   :  { %v734_v48 = vpop.f32.mrf.mxu0 }
 0x165   :  { %v878_v13 = vadd.f32 %v877_v10, %v733_v14  ;;  %1498 = vmatmul.mubr.f32.gmra.mxu0 %v923_v11 }
 0x166   :  { %v737_v49 = vpop.f32.mrf.mxu0 }
 0x167   :  { %v924_v18 = vmax.f32 %v878_v13, 0.0  ;;  %v738_v19 = vadd.f32 %v737_v49, %v593_v12 }
 0x168   :  { %v739_v22 = vpop.f32.mrf.mxu0 }
 0x169   :  { %v883_v17 = vadd.f32 %v1446_v63, %v738_v19  ;;  %1500 = vmatprep.mubr.f32.mxu1 %v924_v18 }
 0x16a   :  { %v742_v52 = vpop.f32.mrf.mxu0 }
 0x16b   :  { %v925_v23 = vmax.f32 %v883_v17, 0.0  ;;  %v743_v26 = vadd.f32 %v742_v52, %v598_v16 }
 0x16c   :  { %v744_v27 = vpop.f32.mrf.mxu0 }
 0x16d   :  { %v888_v21 = vadd.f32 %v887_v53, %v743_v26  ;;  %1501 = vmatmul.mubr.f32.vlgmr.msra.gmra.mxu1 %v925_v23 }
 0x16e   :  { %v747_v30 = vpop.f32.mrf.mxu0 }
 0x16f   :  { %v926_v57 = vmax.f32 %v888_v21, 0.0  ;;  %v748_v31 = vadd.f32 %v747_v30, %v603_v20 }
 0x170   :  { %v749_v34 = vpop.f32.mrf.mxu0 }
 0x171   :  { %v893_v25 = vadd.f32 %v1449_v15, %v748_v31  ;;  %1503 = vmatprep.mubr.f32.mxu1 %v926_v57 }
 0x172   :  { %v752_v35 = vpop.f32.mrf.mxu0 }
 0x173   :  { %v927_v39 = vmax.f32 %v893_v25, 0.0  ;;  %v753_v60 = vadd.f32 %v752_v35, %v608_v24 }
 0x174   :  { %v754_v61 = vpop.f32.mrf.mxu0 }
 0x175   :  { %v898_v29 = vadd.f32 %v897_v38, %v753_v60  ;;  %1504 = vmatmul.mubr.f32.gmra.mxu1 %v927_v39 }
 0x176   :  { %v757_v42 = vpop.f32.mrf.mxu0 }
 0x177   :  { %v928_v46 = vmax.f32 %v898_v29, 0.0  ;;  %v758_v47 = vadd.f32 %v757_v42, %v613_v28 }
 0x178   :  { %v759_v50 = vpop.f32.mrf.mxu0 }
 0x179   :  { %v903_v33 = vadd.f32 %v1452_v56, %v758_v47  ;;  %1506 = vmatprep.mubr.f32.mxu1 %v928_v46 }
 0x17a   :  { %v762_v0 = vpop.f32.mrf.mxu0 }
 0x17b   :  { %v929_v51 = vmax.f32 %v903_v33, 0.0  ;;  %v763_v54 = vadd.f32 %v762_v0, %v618_v32 }
 0x17c   :  { %v764_v55 = vpop.f32.mrf.mxu0 }
 0x17d   :  { %v908_v37 = vadd.f32 %v907_v1, %v763_v54  ;;  %1507 = vmatmul.mubr.f32.gmra.mxu1 %v929_v51 }
 0x17e   :  { %v767_v58 = vpop.f32.mrf.mxu0 }
 0x17f   :  { %v930_v59 = vmax.f32 %v908_v37, 0.0  ;;  %v768_v4 = vadd.f32 %v767_v58, %v623_v36 }
 0x180   :  { %v769_v5 = vpop.f32.mrf.mxu0 }
 0x181   :  { %v913_v62 = vadd.f32 %v1455_v43, %v768_v4  ;;  %1509 = vmatprep.mubr.f32.mxu1 %v930_v59 }
 0x183   :  { %v931_v63 = vmax.f32 %v913_v62, 0.0 }
 0x185   :  { %1510 = vmatmul.mubr.f32.gmra.mxu1 %v931_v63 }
 0x20d   :  { %v1490_v2 = vpop.f32.mrf.mxu0 }
 0x20e   :  { %v1097_v3 = vsel %vm1095_vm1, %v1490_v2, -1e+30 }
 0x20f   :  { %1114 = vmax.xlane.f32.xlu0 %v1097_v3  ;;  %v1014_v6 = vpop.f32.mrf.mxu0 }
 0x210   :  { %v1096_v44 = vsel %vm1095_vm1, %v1014_v6, -1e+30 }
 0x213   :  { %1112 = vmax.xlane.f32.xlu0 %v1096_v44 }
 0x215   :  { %v1493_v45 = vpop.f32.mrf.mxu0 }
 0x216   :  { %v1099_v8 = vsel %vm1095_vm1, %v1493_v45, -1e+30 }
 0x217   :  { %1118 = vmax.xlane.f32.xlu1 %v1099_v8  ;;  %v1024_v9 = vpop.f32.mrf.mxu0 }
 0x218   :  { %v1098_v7 = vsel %vm1095_vm1, %v1024_v9, -1e+30 }
 0x21b   :  { %1116 = vmax.xlane.f32.xlu1 %v1098_v7 }
 0x21d   :  { %v1496_v10 = vpop.f32.mrf.mxu0 }
 0x21e   :  { %v1101_v11 = vsel %vm1095_vm1, %v1496_v10, -1e+30 }
 0x21f   :  { %1122 = vmax.xlane.f32.xlu1 %v1101_v11  ;;  %v1034_v14 = vpop.f32.mrf.mxu0 }
 0x220   :  { %v1100_v48 = vsel %vm1095_vm1, %v1034_v14, -1e+30 }
 0x221   :  { %1120 = vmax.xlane.f32.xlu0 %v1100_v48 }
 0x225   :  { %v1499_v12 = vpop.f32.mrf.mxu0 }
 0x226   :  { %v1103_v13 = vsel %vm1095_vm1, %v1499_v12, -1e+30 }
 0x227   :  { %1126 = vmax.xlane.f32.xlu1 %v1103_v13  ;;  %v1044_v49 = vpop.f32.mrf.mxu0 }
 0x228   :  { %v1102_v15 = vsel %vm1095_vm1, %v1044_v49, -1e+30 }
 0x229   :  { %1124 = vmax.xlane.f32.xlu0 %v1102_v15 }
 0x22d   :  { %v1502_v18 = vpop.f32.mrf.mxu1 }
 0x22e   :  { %v2529_v19 = vsel %vm1095_vm1, %v1502_v18, -1e+30 }
 0x22f   :  { %v1054_v22 = vpop.f32.mrf.mxu1  ;;  %1130 = vmax.xlane.f32.xlu1 %v2529_v19 }
 0x230   :  { %v2533_v16 = vsel %vm1095_vm1, %v1054_v22, -1e+30 }
 0x231   :  { %1128 = vmax.xlane.f32.xlu0 %v2533_v16 }
 0x235   :  { %v1505_v17 = vpop.f32.mrf.mxu1 }
 0x236   :  { %v2537_v52 = vsel %vm1095_vm1, %v1505_v17, -1e+30 }
 0x237   :  { %v1064_v53 = vpop.f32.mrf.mxu1  ;;  %1134 = vmax.xlane.f32.xlu1 %v2537_v52 }
 0x238   :  { %v2541_v23 = vsel %vm1095_vm1, %v1064_v53, -1e+30 }
 0x239   :  { %1132 = vmax.xlane.f32.xlu0 %v2541_v23 }
 0x23d   :  { %v1508_v26 = vpop.f32.mrf.mxu1 }
 0x23e   :  { %v2545_v27 = vsel %vm1095_vm1, %v1508_v26, -1e+30 }
 0x23f   :  { %v1074_v20 = vpop.f32.mrf.mxu1  ;;  %1138 = vmax.xlane.f32.xlu1 %v2545_v27 }
 0x240   :  { %v2549_v21 = vsel %vm1095_vm1, %v1074_v20, -1e+30 }
 0x241   :  { %1136 = vmax.xlane.f32.xlu0 %v2549_v21 }
 0x245   :  { %v1511_v30 = vpop.f32.mrf.mxu1 }
 0x246   :  { %v2553_v56 = vsel %vm1095_vm1, %v1511_v30, -1e+30 }
 0x247   :  { %v1084_v57 = vpop.f32.mrf.mxu1  ;;  %1142 = vmax.xlane.f32.xlu1 %v2553_v56 }
 0x248   :  { %v2557_v31 = vsel %vm1095_vm1, %v1084_v57, -1e+30 }
 0x249   :  { %1140 = vmax.xlane.f32.xlu0 %v2557_v31 }
 0x298   :  { %v1115_v34 = vpop.xlane.xlu0 %1114 }
 0x299   :  { %v2560_v24 = vsub.f32 %v1097_v3, %v1115_v34 }
 0x29b   :  { %v1162_v25 = vmul.f32 1.442695, %v2560_v24 }
 0x29c   :  { %v1113_v35 = vpop.xlane.xlu0 %1112 }
 0x29d   :  { %1547 = vpow2.f32 %v1162_v25  ;;  %v2563_v38 = vsub.f32 %v1096_v44, %v1113_v35 }
 0x29f   :  { %v1160_v39 = vmul.f32 1.442695, %v2563_v38 }
 0x2a0   :  { %v1119_v60 = vpop.xlane.xlu1 %1118 }
 0x2a1   :  { %1549 = vpow2.f32 %v1160_v39  ;;  %v2566_v61 = vsub.f32 %v1099_v8, %v1119_v60 }
 0x2a3   :  { %v1166_v28 = vmul.f32 1.442695, %v2566_v61 }
 0x2a4   :  { %v1117_v29 = vpop.xlane.xlu1 %1116 }
 0x2a5   :  { %1551 = vpow2.f32 %v1166_v28  ;;  %v2569_v42 = vsub.f32 %v1098_v7, %v1117_v29 }
 0x2a7   :  { %v1164_v43 = vmul.f32 1.442695, %v2569_v42 }
 0x2a8   :  { %v1123_v46 = vpop.xlane.xlu1 %1122 }
 0x2a9   :  { %1553 = vpow2.f32 %v1164_v43  ;;  %v2572_v47 = vsub.f32 %v1101_v11, %v1123_v46 }
 0x2aa   :  { %v1548_v50 = vpop.eup %1547  ;;  %v1121_v32 = vpop.xlane.xlu0 %1120 }
 0x2ab   :  { %v1170_v33 = vmul.f32 1.442695, %v2572_v47  ;;  %v2575_v0 = vsub.f32 %v1100_v48, %v1121_v32  ;;  %1194 = vadd.xlane.f32.xlu1 %v1548_v50 }
 0x2ad   :  { %1555 = vpow2.f32 %v1170_v33  ;;  %v1168_v1 = vmul.f32 1.442695, %v2575_v0 }
 0x2ae   :  { %v1550_v51 = vpop.eup %1549 }
 0x2af   :  { %1557 = vpow2.f32 %v1168_v1  ;;  %1192 = vadd.xlane.f32.xlu0 %v1550_v51 }
 0x2b0   :  { %v1127_v54 = vpop.xlane.xlu1 %1126 }
 0x2b1   :  { %v2578_v55 = vsub.f32 %v1103_v13, %v1127_v54 }
 0x2b2   :  { %v1552_v36 = vpop.eup %1551  ;;  %v1125_v37 = vpop.xlane.xlu0 %1124 }
 0x2b3   :  { %v1174_v58 = vmul.f32 1.442695, %v2578_v55  ;;  %v2581_v59 = vsub.f32 %v1102_v15, %v1125_v37  ;;  %1198 = vadd.xlane.f32.xlu1 %v1552_v36 }
 0x2b5   :  { %1559 = vpow2.f32 %v1174_v58  ;;  %v1172_v4 = vmul.f32 1.442695, %v2581_v59 }
 0x2b6   :  { %v1554_v5 = vpop.eup %1553 }
 0x2b7   :  { %1561 = vpow2.f32 %v1172_v4  ;;  %1196 = vadd.xlane.f32.xlu0 %v1554_v5 }
 0x2b8   :  { %v1131_v62 = vpop.xlane.xlu1 %1130 }
 0x2b9   :  { %v2585_v63 = vsub.f32 %v2529_v19, %v1131_v62 }
 0x2ba   :  { %v1556_v40 = vpop.eup %1555  ;;  %v1129_v41 = vpop.xlane.xlu0 %1128 }
 0x2bb   :  { %v1178_v2 = vmul.f32 1.442695, %v2585_v63  ;;  %v2589_v3 = vsub.f32 %v2533_v16, %v1129_v41  ;;  %1202 = vadd.xlane.f32.xlu1 %v1556_v40 }
 0x2bc   :  { %v1558_v6 = vpop.eup %1557 }
 0x2bd   :  { %1563 = vpow2.f32 %v1178_v2  ;;  %v1176_v44 = vmul.f32 1.442695, %v2589_v3  ;;  %1200 = vadd.xlane.f32.xlu0 %v1558_v6 }
 0x2bf   :  { %1565 = vpow2.f32 %v1176_v44 }
 0x2c0   :  { %v1135_v45 = vpop.xlane.xlu1 %1134 }
 0x2c1   :  { %v2593_v8 = vsub.f32 %v2537_v52, %v1135_v45 }
 0x2c2   :  { %v1560_v9 = vpop.eup %1559  ;;  %v1133_v7 = vpop.xlane.xlu0 %1132 }
 0x2c3   :  { %v1182_v10 = vmul.f32 1.442695, %v2593_v8  ;;  %v2597_v11 = vsub.f32 %v2541_v23, %v1133_v7  ;;  %1206 = vadd.xlane.f32.xlu1 %v1560_v9 }
 0x2c4   :  { %v1562_v14 = vpop.eup %1561 }
 0x2c5   :  { %1567 = vpow2.f32 %v1182_v10  ;;  %v1180_v48 = vmul.f32 1.442695, %v2597_v11  ;;  %1204 = vadd.xlane.f32.xlu0 %v1562_v14 }
 0x2c7   :  { %1569 = vpow2.f32 %v1180_v48 }
 0x2c8   :  { %v1139_v12 = vpop.xlane.xlu1 %1138 }
 0x2c9   :  { %v2601_v13 = vsub.f32 %v2545_v27, %v1139_v12 }
 0x2ca   :  { %v1564_v49 = vpop.eup %1563  ;;  %v1137_v15 = vpop.xlane.xlu0 %1136 }
 0x2cb   :  { %v1186_v18 = vmul.f32 1.442695, %v2601_v13  ;;  %v2605_v19 = vsub.f32 %v2549_v21, %v1137_v15  ;;  %1210 = vadd.xlane.f32.xlu1 %v1564_v49 }
 0x2cc   :  { %v1566_v22 = vpop.eup %1565 }
 0x2cd   :  { %1571 = vpow2.f32 %v1186_v18  ;;  %v1184_v16 = vmul.f32 1.442695, %v2605_v19  ;;  %1208 = vadd.xlane.f32.xlu0 %v1566_v22 }
 0x2cf   :  { %1573 = vpow2.f32 %v1184_v16 }
 0x2d0   :  { %v1143_v17 = vpop.xlane.xlu1 %1142 }
 0x2d1   :  { %v2609_v52 = vsub.f32 %v2553_v56, %v1143_v17 }
 0x2d2   :  { %v1568_v53 = vpop.eup %1567  ;;  %v1141_v23 = vpop.xlane.xlu0 %1140 }
 0x2d3   :  { %v1190_v26 = vmul.f32 1.442695, %v2609_v52  ;;  %v2613_v27 = vsub.f32 %v2557_v31, %v1141_v23  ;;  %1214 = vadd.xlane.f32.xlu1 %v1568_v53 }
 0x2d4   :  { %v1570_v20 = vpop.eup %1569 }
 0x2d5   :  { %1575 = vpow2.f32 %v1190_v26  ;;  %v1188_v21 = vmul.f32 1.442695, %v2613_v27  ;;  %1212 = vadd.xlane.f32.xlu0 %v1570_v20 }
 0x2d7   :  { %1577 = vpow2.f32 %v1188_v21 }
 0x2da   :  { %v1572_v30 = vpop.eup %1571 }
 0x2db   :  { %1218 = vadd.xlane.f32.xlu1 %v1572_v30 }
 0x2dc   :  { %v1574_v57 = vpop.eup %1573 }
 0x2dd   :  { %1216 = vadd.xlane.f32.xlu0 %v1574_v57 }
 0x2e2   :  { %v1576_v56 = vpop.eup %1575 }
 0x2e3   :  { %1222 = vadd.xlane.f32.xlu1 %v1576_v56 }
 0x2e4   :  { %v1578_v34 = vpop.eup %1577 }
 0x2e5   :  { %1220 = vadd.xlane.f32.xlu0 %v1578_v34 }
 0x334   :  { %v1195_v25 = vpop.xlane.xlu1 %1194 }
 0x335   :  { %1579 = vlog2.f32 %v1195_v25 }
 0x338   :  { %v1193_v35 = vpop.xlane.xlu0 %1192 }
 0x339   :  { %1581 = vlog2.f32 %v1193_v35 }
 0x33c   :  { %v1199_v31 = vpop.xlane.xlu1 %1198 }
 0x33d   :  { %1583 = vlog2.f32 %v1199_v31 }
 0x340   :  { %v1197_v39 = vpop.xlane.xlu0 %1196 }
 0x341   :  { %1585 = vlog2.f32 %v1197_v39 }
 0x342   :  { %v1580_v60 = vpop.eup %1579 }
 0x343   :  { %v1227_v28 = vmul.f32 0.6931472, %v1580_v60 }
 0x344   :  { %v1203_v29 = vpop.xlane.xlu1 %1202 }
 0x345   :  { %v1257_v43 = vsub.f32 %v2560_v24, %v1227_v28  ;;  %1587 = vlog2.f32 %v1203_v29 }
 0x346   :  { %v1582_v46 = vpop.eup %1581  ;;  %v1201_v50 = vpop.xlane.xlu0 %1200 }
 0x347   :  { %1273 = vst [vmem:[#allocation2 + $0x8] sm:$0xff] %v1257_v43  ;;  %v1225_v32 = vmul.f32 0.6931472, %v1582_v46  ;;  %1589 = vlog2.f32 %v1201_v50 }
 0x349   :  { %v1256_v33 = vsub.f32 %v2563_v38, %v1225_v32 }
 0x34a   :  { %v1584_v1 = vpop.eup %1583 }
 0x34b   :  { %1272 = vst [vmem:[#allocation2] sm:$0xff] %v1256_v33  ;;  %v1231_v51 = vmul.f32 0.6931472, %v1584_v1 }
 0x34c   :  { %v1207_v54 = vpop.xlane.xlu1 %1206 }
 0x34d   :  { %v1259_v36 = vsub.f32 %v2566_v61, %v1231_v51  ;;  %1591 = vlog2.f32 %v1207_v54 }
 0x34e   :  { %v1586_v37 = vpop.eup %1585  ;;  %v1205_v58 = vpop.xlane.xlu0 %1204 }
 0x34f   :  { %1275 = vst [vmem:[#allocation2 + $0x18] sm:$0xff] %v1259_v36  ;;  %v1229_v4 = vmul.f32 0.6931472, %v1586_v37  ;;  %1593 = vlog2.f32 %v1205_v58 }
 0x351   :  { %v1258_v24 = vsub.f32 %v2569_v42, %v1229_v4 }
 0x352   :  { %v1588_v5 = vpop.eup %1587 }
 0x353   :  { %1274 = vst [vmem:[#allocation2 + $0x10] sm:$0xff] %v1258_v24  ;;  %v1235_v62 = vmul.f32 0.6931472, %v1588_v5 }
 0x354   :  { %v1590_v40 = vpop.eup %1589  ;;  %v1211_v41 = vpop.xlane.xlu1 %1210 }
 0x355   :  { %v1261_v38 = vsub.f32 %v2572_v47, %v1235_v62  ;;  %v1233_v2 = vmul.f32 0.6931472, %v1590_v40  ;;  %1595 = vlog2.f32 %v1211_v41 }
 0x356   :  { %v1209_v6 = vpop.xlane.xlu0 %1208 }
 0x357   :  { %1277 = vst [vmem:[#allocation2 + $0x28] sm:$0xff] %v1261_v38  ;;  %v1260_v61 = vsub.f32 %v2575_v0, %v1233_v2  ;;  %1597 = vlog2.f32 %v1209_v6 }
 0x359   :  { %1276 = vst [vmem:[#allocation2 + $0x20] sm:$0xff] %v1260_v61 }
 0x35a   :  { %v1592_v44 = vpop.eup %1591 }
 0x35b   :  { %v1239_v45 = vmul.f32 0.6931472, %v1592_v44 }
 0x35c   :  { %v1594_v9 = vpop.eup %1593  ;;  %v1215_v7 = vpop.xlane.xlu1 %1214 }
 0x35d   :  { %v1263_v42 = vsub.f32 %v2578_v55, %v1239_v45  ;;  %v1237_v10 = vmul.f32 0.6931472, %v1594_v9  ;;  %1599 = vlog2.f32 %v1215_v7 }
 0x35e   :  { %v1213_v14 = vpop.xlane.xlu0 %1212 }
 0x35f   :  { %1279 = vst [vmem:[#allocation2 + $0x38] sm:$0xff] %v1263_v42  ;;  %v1262_v47 = vsub.f32 %v2581_v59, %v1237_v10  ;;  %1601 = vlog2.f32 %v1213_v14 }
 0x361   :  { %1278 = vst [vmem:[#allocation2 + $0x30] sm:$0xff] %v1262_v47 }
 0x362   :  { %v1596_v48 = vpop.eup %1595 }
 0x363   :  { %v1243_v12 = vmul.f32 0.6931472, %v1596_v48 }
 0x364   :  { %v1598_v49 = vpop.eup %1597  ;;  %v1219_v0 = vpop.xlane.xlu1 %1218 }
 0x365   :  { %v1265_v15 = vsub.f32 %v2585_v63, %v1243_v12  ;;  %v1241_v18 = vmul.f32 0.6931472, %v1598_v49  ;;  %1603 = vlog2.f32 %v1219_v0 }
 0x366   :  { %v1217_v22 = vpop.xlane.xlu0 %1216 }
 0x367   :  { %1281 = vst [vmem:[#allocation2 + $0x48] sm:$0xff] %v1265_v15  ;;  %v1264_v55 = vsub.f32 %v2589_v3, %v1241_v18  ;;  %1605 = vlog2.f32 %v1217_v22 }
 0x369   :  { %1280 = vst [vmem:[#allocation2 + $0x40] sm:$0xff] %v1264_v55 }
 0x36a   :  { %v1600_v16 = vpop.eup %1599 }
 0x36b   :  { %v1247_v17 = vmul.f32 0.6931472, %v1600_v16 }
 0x36c   :  { %v1602_v53 = vpop.eup %1601  ;;  %v1223_v59 = vpop.xlane.xlu1 %1222 }
 0x36d   :  { %v1267_v23 = vsub.f32 %v2593_v8, %v1247_v17  ;;  %v1245_v26 = vmul.f32 0.6931472, %v1602_v53  ;;  %1607 = vlog2.f32 %v1223_v59 }
 0x36e   :  { %v1221_v20 = vpop.xlane.xlu0 %1220 }
 0x36f   :  { %1283 = vst [vmem:[#allocation2 + $0x58] sm:$0xff] %v1267_v23  ;;  %v1266_v63 = vsub.f32 %v2597_v11, %v1245_v26  ;;  %1609 = vlog2.f32 %v1221_v20 }
 0x371   :  { %1282 = vst [vmem:[#allocation2 + $0x50] sm:$0xff] %v1266_v63 }
 0x372   :  { %v1604_v21 = vpop.eup %1603 }
 0x373   :  { %v1251_v30 = vmul.f32 0.6931472, %v1604_v21 }
 0x374   :  { %v1606_v57 = vpop.eup %1605 }
 0x375   :  { %v1269_v3 = vsub.f32 %v2601_v13, %v1251_v30  ;;  %v1249_v56 = vmul.f32 0.6931472, %v1606_v57 }
 0x377   :  { %1285 = vst [vmem:[#allocation2 + $0x68] sm:$0xff] %v1269_v3  ;;  %v1268_v34 = vsub.f32 %v2605_v19, %v1249_v56 }
 0x379   :  { %1284 = vst [vmem:[#allocation2 + $0x60] sm:$0xff] %v1268_v34 }
 0x37a   :  { %v1608_v25 = vpop.eup %1607 }
 0x37b   :  { %v1255_v8 = vmul.f32 0.6931472, %v1608_v25 }
 0x37c   :  { %v1610_v35 = vpop.eup %1609 }
 0x37d   :  { %v1271_v31 = vsub.f32 %v2609_v52, %v1255_v8  ;;  %v1253_v11 = vmul.f32 0.6931472, %v1610_v35 }
 0x37f   :  { %1287 = vst [vmem:[#allocation2 + $0x78] sm:$0xff] %v1271_v31  ;;  %v1270_v39 = vsub.f32 %v2613_v27, %v1253_v11 }
 0x381   :  { %1286 = vst [vmem:[#allocation2 + $0x70] sm:$0xff] %v1270_v39 }
 0x382   :  { %1622 = shalt.err (!%p1619_p4)
}
 0x383   :  { %s1634_s29 = smov 128   ;;  %s1635_s30 = smov 8  }
 0x384   :  { %1299 = dma.vmem_to_hbm [thread:$0]  %s1294_s27, 2048, %s2638_s3, [#allocation3], %s1634_s29, %s1634_s29, %s1635_s30  }
 0x385   :  { %1631 = dma.done.wait [#allocation3], 2048  }
 0x386   :  { %1632 = vsyncadd [#allocation3], 4294965248 }
 0x387   :  { %1303 = vsyncpa [#allocation3], 1 }

</bundles_post_ra>
